<compile_context>
chip_gen: v7x
topology: tpu7x:2x2x1
jax: 0.10.0
libtpu: 0.0.40
codegen_flags: <defaults>
</compile_context>

<pallas_src>
import functools

import jax
import jax.numpy as jnp
import numpy as np
from jax.experimental import pallas as pl
from jax.experimental.pallas import tpu as pltpu

_BN_EPS = 1e-5

# static toy-backbone geometry
_OH = _OW = 8          # spatial after the stride-2 stem on a 16x16 input
_C_STEM = 16           # stem channels
_C_MID = 8             # bottleneck mid channels
_C_OUT = 32            # bottleneck out channels (= num_ftrs)
_FEATURE_DIM = 128
_G_HIDDEN = 512
_N_TAPS = 9            # 3x3 conv taps


# ----------------------------- the fused kernel -----------------------------

def _simclr_fused_kernel(
    patches1_ref, w1_ref, s1_ref,          # stem conv (im2col LHS precomputed)
    wa_ref, sa_ref,                        # bottleneck 1x1 a
    wb_ref, sb_ref,                        # bottleneck 3x3 b
    wc_ref, sc_ref,                        # bottleneck 1x1 c
    wd_ref, sd_ref,                        # downsample 1x1 d
    shift_ref, pool_ref,                   # spatial operators (0/1 matrices)
    wfc_ref, bfc_ref,                      # backbone fc
    wg1_ref, sg1_ref, wg2_ref, bg2_ref,    # projection head g
    feat_ref, out_ref,                     # outputs
    *, n_taps, c_mid):
  f32, bf16 = jnp.float32, jnp.bfloat16

  def mm(lhs_f32, w_ref):
    # bf16 MXU operands, f32 accumulation.
    return jnp.dot(lhs_f32.astype(bf16), w_ref[...], preferred_element_type=f32)

  # --- stem: conv 3x3 s2 p1 (+ folded BN) + ReLU -------------------- (R, 16)
  h = jnp.maximum(
      jnp.dot(patches1_ref[...], w1_ref[...], preferred_element_type=f32)
      + s1_ref[...], 0.0)

  # --- bottleneck a: 1x1 conv (+BN) + ReLU --------------------------- (R, 8)
  a = jnp.maximum(mm(h, wa_ref) + sa_ref[...], 0.0)
  a_bf = a.astype(bf16)

  # --- bottleneck b: 3x3 conv s1 p1 (+BN) + ReLU --------------------- (R, 8)
  # im2col of the in-kernel intermediate `a`, built as 9 exact 0/1 shift
  # matmuls (shift_ref[j] selects the spatially shifted & zero-padded rows).
  b_pre = None
  for j in range(n_taps):
    shifted = jnp.dot(shift_ref[j], a_bf, preferred_element_type=f32)  # exact
    contrib = jnp.dot(shifted.astype(bf16),
                      wb_ref[j * c_mid:(j + 1) * c_mid, :],
                      preferred_element_type=f32)
    b_pre = contrib if b_pre is None else b_pre + contrib
  b_act = jnp.maximum(b_pre + sb_ref[...], 0.0)

  # --- bottleneck c / downsample d (+BN), residual add + ReLU ------- (R, 32)
  c = mm(b_act, wc_ref) + sc_ref[...]
  d = mm(h, wd_ref) + sd_ref[...]
  y = jnp.maximum(c + d, 0.0)

  # --- global average pool (pooling matmul) fused with backbone fc -- (B, 128)
  pooled = jnp.dot(pool_ref[...], y, preferred_element_type=f32)       # (B, 32)
  feature = mm(pooled, wfc_ref) + bfc_ref[...]

  # --- projection head g: Linear(no bias)+BN(folded)+ReLU -> Dropout -> Linear
  h1 = jnp.maximum(mm(feature, wg1_ref) + sg1_ref[...], 0.0)
  # TODO(synk): Dropout(p=0.3) is identity here (eval-mode / deterministic).
  g_out = mm(h1, wg2_ref) + bg2_ref[...]

  # --- F.normalize(x, dim=-1): x / max(||x||, 1e-12), rsqrt on the EUP ------
  def l2n(v):
    ss = jnp.sum(v * v, axis=-1, keepdims=True)
    return v * jax.lax.rsqrt(jnp.maximum(ss, 1e-24))

  feat_ref[...] = l2n(feature).astype(feat_ref.dtype)
  out_ref[...] = l2n(g_out).astype(out_ref.dtype)


# ----------------------------- wrapper-side prep -----------------------------

def _im2col_nhwc(x_nhwc, kh, kw, stride, pad):
  # plain-JAX data prep for the stem conv only; ordering = (ki, kj) major,
  # channel fastest (matches the weight-matrix construction below).
  x = jnp.pad(x_nhwc, ((0, 0), (pad, pad), (pad, pad), (0, 0)))
  B, H, W, C = x.shape
  OH = (H - kh) // stride + 1
  OW = (W - kw) // stride + 1
  cols = []
  for i in range(kh):
    for j in range(kw):
      cols.append(x[:, i:i + stride * OH:stride, j:j + stride * OW:stride, :])
  patches = jnp.concatenate(cols, axis=-1)
  return patches.reshape(B * OH * OW, kh * kw * C), OH, OW


def _fold_conv_bn(w_oihw, bn):
  # conv (no bias) + eval-mode BN: fold the BN scale into the weight columns,
  # keep the shift as an f32 (1, Cout) row.  Weights stored bf16 for the MXU.
  gamma, beta, mean, var = bn
  cout, cin, kh, kw = w_oihw.shape
  inv = gamma / jnp.sqrt(var + _BN_EPS)
  w_mat = jnp.transpose(w_oihw, (2, 3, 1, 0)).reshape(kh * kw * cin, cout)
  w_mat = (w_mat * inv[None, :]).astype(jnp.bfloat16)
  shift = (beta - mean * inv).reshape(1, cout).astype(jnp.float32)
  return w_mat, shift


def _build_spatial_operators(batch, oh, ow):
  # 0/1 shift matrices for the in-kernel 3x3 (stride 1, pad 1) im2col, plus
  # the global-average-pool matrix.  Exact in bf16 (values 0/1 and 1/64).
  n = batch * oh * ow
  r = np.arange(n)
  b = r // (oh * ow)
  y = (r // ow) % oh
  x = r % ow
  mats = []
  for di in (-1, 0, 1):
    for dj in (-1, 0, 1):
      yy, xx = y + di, x + dj
      valid = (yy >= 0) & (yy < oh) & (xx >= 0) & (xx < ow)
      src = b * oh * ow + np.clip(yy, 0, oh - 1) * ow + np.clip(xx, 0, ow - 1)
      m = np.zeros((n, n), np.float32)
      m[r[valid], src[valid]] = 1.0
      mats.append(m)
  shift_mats = jnp.asarray(np.stack(mats, 0)).astype(jnp.bfloat16)  # (9, n, n)
  pool = np.zeros((batch, n), np.float32)
  pool[b, r] = 1.0 / (oh * ow)
  return shift_mats, jnp.asarray(pool)


def prepare_operands(params, batch):
  # Hoisted out of the forward pass: BN folding, Linear transposes, bf16 casts,
  # K-padding of the stem im2col GEMM (27 -> 32), spatial operator matrices.
  p = params
  w1, s1 = _fold_conv_bn(p["conv1_w"], p["bn1"])
  k1, k1_pad = w1.shape[0], 32
  w1 = jnp.pad(w1, ((0, k1_pad - k1), (0, 0)))
  wa, sa = _fold_conv_bn(p["ca_w"], p["bna"])
  wb, sb = _fold_conv_bn(p["cb_w"], p["bnb"])
  wc, sc = _fold_conv_bn(p["cc_w"], p["bnc"])
  wd, sd = _fold_conv_bn(p["cd_w"], p["bnd"])
  shift_mats, pool = _build_spatial_operators(batch, _OH, _OW)
  # backbone fc: torch Linear y = x @ W.T + b
  wfc = jnp.transpose(p["fc_w"]).astype(jnp.bfloat16)
  bfc = p["fc_b"].reshape(1, -1).astype(jnp.float32)
  # projection head: Linear(feat,512,bias=False) + BN1d(512) eval, folded
  inv = p["g_bn_gamma"] / jnp.sqrt(p["g_bn_var"] + _BN_EPS)
  wg1 = (jnp.transpose(p["g1_w"]) * inv[None, :]).astype(jnp.bfloat16)
  sg1 = (p["g_bn_beta"] - p["g_bn_mean"] * inv).reshape(1, -1).astype(jnp.float32)
  wg2 = jnp.transpose(p["g2_w"]).astype(jnp.bfloat16)
  bg2 = p["g2_b"].reshape(1, -1).astype(jnp.float32)
  return dict(w1=w1, s1=s1, wa=wa, sa=sa, wb=wb, sb=sb, wc=wc, sc=sc,
              wd=wd, sd=sd, shift_mats=shift_mats, pool=pool,
              wfc=wfc, bfc=bfc, wg1=wg1, sg1=sg1, wg2=wg2, bg2=bg2)


def simclr_stage1_forward(ops, x_nchw):
  # torch.cat([x, x, x], dim=1), NCHW -> NHWC, stem im2col: plain-JAX data prep.
  x = jnp.concatenate([x_nchw, x_nchw, x_nchw], axis=1)
  x = jnp.transpose(x, (0, 2, 3, 1)).astype(jnp.float32)
  patches1, oh, ow = _im2col_nhwc(x, 3, 3, stride=2, pad=1)     # (B*64, 27)
  assert (oh, ow) == (_OH, _OW)
  patches1 = jnp.pad(
      patches1, ((0, 0), (0, ops["w1"].shape[0] - patches1.shape[1]))
  ).astype(jnp.bfloat16)

  batch = x_nchw.shape[0]
  args = (patches1, ops["w1"], ops["s1"], ops["wa"], ops["sa"],
          ops["wb"], ops["sb"], ops["wc"], ops["sc"], ops["wd"], ops["sd"],
          ops["shift_mats"], ops["pool"], ops["wfc"], ops["bfc"],
          ops["wg1"], ops["sg1"], ops["wg2"], ops["bg2"])

  vmem = pl.BlockSpec(memory_space=pltpu.MemorySpace.VMEM)
  feat_n, out_n = pl.pallas_call(
      functools.partial(_simclr_fused_kernel, n_taps=_N_TAPS, c_mid=_C_MID),
      out_shape=(jax.ShapeDtypeStruct((batch, _FEATURE_DIM), jnp.float32),
                 jax.ShapeDtypeStruct((batch, _FEATURE_DIM), jnp.float32)),
      in_specs=[vmem] * len(args),
      out_specs=(vmem, vmem),
  )(*args)
  return feat_n, out_n


# ----------------------------- parameter init -----------------------------

def init_params(key, feature_dim=_FEATURE_DIM):
  keys = iter(jax.random.split(key, 64))

  def randn(shape, s=0.1):
    return s * jax.random.normal(next(keys), shape, dtype=jnp.float32)

  def bn_params(c):
    return (jnp.ones((c,), jnp.float32) + randn((c,), 0.02),   # gamma
            randn((c,), 0.02),                                  # beta
            randn((c,), 0.02),                                  # running_mean
            jnp.ones((c,), jnp.float32) + 0.1)                  # running_var

  C1, CM, CO = _C_STEM, _C_MID, _C_OUT
  return {
      "conv1_w": randn((C1, 3, 3, 3)),      "bn1": bn_params(C1),
      "ca_w": randn((CM, C1, 1, 1)),        "bna": bn_params(CM),
      "cb_w": randn((CM, CM, 3, 3)),        "bnb": bn_params(CM),
      "cc_w": randn((CO, CM, 1, 1)),        "bnc": bn_params(CO),
      "cd_w": randn((CO, C1, 1, 1)),        "bnd": bn_params(CO),
      "fc_w": randn((feature_dim, CO)),     "fc_b": randn((feature_dim,)),
      "g1_w": randn((_G_HIDDEN, feature_dim)),
      "g_bn_gamma": jnp.ones((_G_HIDDEN,), jnp.float32) + 0.01,
      "g_bn_beta": randn((_G_HIDDEN,), 0.02),
      "g_bn_mean": randn((_G_HIDDEN,), 0.02),
      "g_bn_var": jnp.ones((_G_HIDDEN,), jnp.float32) + 0.1,
      "g2_w": randn((feature_dim, _G_HIDDEN)),
      "g2_b": randn((feature_dim,)),
  }


# ----------------------------- main -----------------------------

if __name__ == "__main__":
  key = jax.random.PRNGKey(0)
  pkey, xkey = jax.random.split(key)
  params = init_params(pkey, feature_dim=_FEATURE_DIM)
  operands = prepare_operands(params, batch=2)

  # small NCHW input; torch.cat([x,x,x], dim=1) in forward makes it 3-channel
  x = jax.random.normal(xkey, (2, 1, 16, 16), dtype=jnp.float32)

  fwd = jax.jit(simclr_stage1_forward)
  feature_n, out_n = fwd(operands, x)
  jax.block_until_ready((feature_n, out_n))

  assert feature_n.shape == (2, _FEATURE_DIM) and out_n.shape == (2, _FEATURE_DIM)
  # both outputs are L2-normalized along dim=-1
  assert bool(jnp.allclose(jnp.sum(feature_n ** 2, axis=-1), 1.0, atol=1e-3))
  assert bool(jnp.allclose(jnp.sum(out_n ** 2, axis=-1), 1.0, atol=1e-3))
  print("KERNEL_OK")
</pallas_src>

<mosaic_0001>
module attributes {stable_mosaic.version = 11 : i64} {
  func.func @_simclr_fused_kernel(%arg0: memref<128x32xbf16, #tpu.memory_space<vmem>>, %arg1: memref<32x16xbf16, #tpu.memory_space<vmem>>, %arg2: memref<1x16xf32, #tpu.memory_space<vmem>>, %arg3: memref<16x8xbf16, #tpu.memory_space<vmem>>, %arg4: memref<1x8xf32, #tpu.memory_space<vmem>>, %arg5: memref<72x8xbf16, #tpu.memory_space<vmem>>, %arg6: memref<1x8xf32, #tpu.memory_space<vmem>>, %arg7: memref<8x32xbf16, #tpu.memory_space<vmem>>, %arg8: memref<1x32xf32, #tpu.memory_space<vmem>>, %arg9: memref<16x32xbf16, #tpu.memory_space<vmem>>, %arg10: memref<1x32xf32, #tpu.memory_space<vmem>>, %arg11: memref<9x128x128xbf16, #tpu.memory_space<vmem>>, %arg12: memref<2x128xf32, #tpu.memory_space<vmem>>, %arg13: memref<32x128xbf16, #tpu.memory_space<vmem>>, %arg14: memref<1x128xf32, #tpu.memory_space<vmem>>, %arg15: memref<128x512xbf16, #tpu.memory_space<vmem>>, %arg16: memref<1x512xf32, #tpu.memory_space<vmem>>, %arg17: memref<512x128xbf16, #tpu.memory_space<vmem>>, %arg18: memref<1x128xf32, #tpu.memory_space<vmem>>, %arg19: memref<2x128xf32, #tpu.memory_space<vmem>>, %arg20: memref<2x128xf32, #tpu.memory_space<vmem>>) attributes {dimension_semantics = [], scalar_prefetch = 0 : i64, scratch_operands = 0 : i64, tpu.core_type = #tpu.core_type<tc>} {
    %c0 = arith.constant 0 : index
    %c0_0 = arith.constant 0 : index
    %0 = vector.load %arg0[%c0, %c0_0] : memref<128x32xbf16, #tpu.memory_space<vmem>>, vector<128x32xbf16>
    %c0_1 = arith.constant 0 : index
    %c0_2 = arith.constant 0 : index
    %1 = vector.load %arg1[%c0_1, %c0_2] : memref<32x16xbf16, #tpu.memory_space<vmem>>, vector<32x16xbf16>
    %cst = arith.constant dense<0.000000e+00> : vector<128x16xf32>
    %2 = tpu.matmul %0, %1, %cst {dimension_numbers = #tpu.dot_dimension_numbers<[1], [0], [0], [1], [0, 0, 1, 1], [], []>} : vector<128x32xbf16>, vector<32x16xbf16>, vector<128x16xf32> -> vector<128x16xf32>
    %c0_3 = arith.constant 0 : index
    %c0_4 = arith.constant 0 : index
    %3 = vector.load %arg2[%c0_3, %c0_4] : memref<1x16xf32, #tpu.memory_space<vmem>>, vector<1x16xf32>
    %4 = vector.broadcast %3 : vector<1x16xf32> to vector<128x16xf32>
    %5 = arith.addf %2, %4 : vector<128x16xf32>
    %cst_5 = arith.constant 0.000000e+00 : f32
    %6 = vector.broadcast %cst_5 : f32 to vector<128x16xf32>
    %7 = arith.maximumf %5, %6 : vector<128x16xf32>
    %8 = arith.truncf %7 : vector<128x16xf32> to vector<128x16xbf16>
    %c0_6 = arith.constant 0 : index
    %c0_7 = arith.constant 0 : index
    %9 = vector.load %arg3[%c0_6, %c0_7] : memref<16x8xbf16, #tpu.memory_space<vmem>>, vector<16x8xbf16>
    %cst_8 = arith.constant dense<0.000000e+00> : vector<128x8xf32>
    %10 = tpu.matmul %8, %9, %cst_8 {dimension_numbers = #tpu.dot_dimension_numbers<[1], [0], [0], [1], [0, 0, 1, 1], [], []>} : vector<128x16xbf16>, vector<16x8xbf16>, vector<128x8xf32> -> vector<128x8xf32>
    %c0_9 = arith.constant 0 : index
    %c0_10 = arith.constant 0 : index
    %11 = vector.load %arg4[%c0_9, %c0_10] : memref<1x8xf32, #tpu.memory_space<vmem>>, vector<1x8xf32>
    %12 = vector.broadcast %11 : vector<1x8xf32> to vector<128x8xf32>
    %13 = arith.addf %10, %12 : vector<128x8xf32>
    %cst_11 = arith.constant 0.000000e+00 : f32
    %14 = vector.broadcast %cst_11 : f32 to vector<128x8xf32>
    %15 = arith.maximumf %13, %14 : vector<128x8xf32>
    %16 = arith.truncf %15 : vector<128x8xf32> to vector<128x8xbf16>
    %c0_12 = arith.constant 0 : index
    %c0_13 = arith.constant 0 : index
    %c0_14 = arith.constant 0 : index
    %17 = vector.load %arg11[%c0_12, %c0_13, %c0_14] : memref<9x128x128xbf16, #tpu.memory_space<vmem>>, vector<1x128x128xbf16>
    %18 = vector.shape_cast %17 : vector<1x128x128xbf16> to vector<128x128xbf16>
    %cst_15 = arith.constant dense<0.000000e+00> : vector<128x8xf32>
    %19 = tpu.matmul %18, %16, %cst_15 {dimension_numbers = #tpu.dot_dimension_numbers<[1], [0], [0], [1], [0, 0, 1, 1], [], []>} : vector<128x128xbf16>, vector<128x8xbf16>, vector<128x8xf32> -> vector<128x8xf32>
    %20 = arith.truncf %19 : vector<128x8xf32> to vector<128x8xbf16>
    %c0_16 = arith.constant 0 : index
    %c0_17 = arith.constant 0 : index
    %21 = vector.load %arg5[%c0_16, %c0_17] : memref<72x8xbf16, #tpu.memory_space<vmem>>, vector<8x8xbf16>
    %cst_18 = arith.constant dense<0.000000e+00> : vector<128x8xf32>
    %22 = tpu.matmul %20, %21, %cst_18 {dimension_numbers = #tpu.dot_dimension_numbers<[1], [0], [0], [1], [0, 0, 1, 1], [], []>} : vector<128x8xbf16>, vector<8x8xbf16>, vector<128x8xf32> -> vector<128x8xf32>
    %c1 = arith.constant 1 : index
    %c0_19 = arith.constant 0 : index
    %c0_20 = arith.constant 0 : index
    %23 = vector.load %arg11[%c1, %c0_19, %c0_20] : memref<9x128x128xbf16, #tpu.memory_space<vmem>>, vector<1x128x128xbf16>
    %24 = vector.shape_cast %23 : vector<1x128x128xbf16> to vector<128x128xbf16>
    %cst_21 = arith.constant dense<0.000000e+00> : vector<128x8xf32>
    %25 = tpu.matmul %24, %16, %cst_21 {dimension_numbers = #tpu.dot_dimension_numbers<[1], [0], [0], [1], [0, 0, 1, 1], [], []>} : vector<128x128xbf16>, vector<128x8xbf16>, vector<128x8xf32> -> vector<128x8xf32>
    %26 = arith.truncf %25 : vector<128x8xf32> to vector<128x8xbf16>
    %c8 = arith.constant 8 : index
    %c0_22 = arith.constant 0 : index
    %27 = vector.load %arg5[%c8, %c0_22] : memref<72x8xbf16, #tpu.memory_space<vmem>>, vector<8x8xbf16>
    %cst_23 = arith.constant dense<0.000000e+00> : vector<128x8xf32>
    %28 = tpu.matmul %26, %27, %cst_23 {dimension_numbers = #tpu.dot_dimension_numbers<[1], [0], [0], [1], [0, 0, 1, 1], [], []>} : vector<128x8xbf16>, vector<8x8xbf16>, vector<128x8xf32> -> vector<128x8xf32>
    %29 = arith.addf %22, %28 : vector<128x8xf32>
    %c2 = arith.constant 2 : index
    %c0_24 = arith.constant 0 : index
    %c0_25 = arith.constant 0 : index
    %30 = vector.load %arg11[%c2, %c0_24, %c0_25] : memref<9x128x128xbf16, #tpu.memory_space<vmem>>, vector<1x128x128xbf16>
    %31 = vector.shape_cast %30 : vector<1x128x128xbf16> to vector<128x128xbf16>
    %cst_26 = arith.constant dense<0.000000e+00> : vector<128x8xf32>
    %32 = tpu.matmul %31, %16, %cst_26 {dimension_numbers = #tpu.dot_dimension_numbers<[1], [0], [0], [1], [0, 0, 1, 1], [], []>} : vector<128x128xbf16>, vector<128x8xbf16>, vector<128x8xf32> -> vector<128x8xf32>
    %33 = arith.truncf %32 : vector<128x8xf32> to vector<128x8xbf16>
    %c16 = arith.constant 16 : index
    %c0_27 = arith.constant 0 : index
    %34 = vector.load %arg5[%c16, %c0_27] : memref<72x8xbf16, #tpu.memory_space<vmem>>, vector<8x8xbf16>
    %cst_28 = arith.constant dense<0.000000e+00> : vector<128x8xf32>
    %35 = tpu.matmul %33, %34, %cst_28 {dimension_numbers = #tpu.dot_dimension_numbers<[1], [0], [0], [1], [0, 0, 1, 1], [], []>} : vector<128x8xbf16>, vector<8x8xbf16>, vector<128x8xf32> -> vector<128x8xf32>
    %36 = arith.addf %29, %35 : vector<128x8xf32>
    %c3 = arith.constant 3 : index
    %c0_29 = arith.constant 0 : index
    %c0_30 = arith.constant 0 : index
    %37 = vector.load %arg11[%c3, %c0_29, %c0_30] : memref<9x128x128xbf16, #tpu.memory_space<vmem>>, vector<1x128x128xbf16>
    %38 = vector.shape_cast %37 : vector<1x128x128xbf16> to vector<128x128xbf16>
    %cst_31 = arith.constant dense<0.000000e+00> : vector<128x8xf32>
    %39 = tpu.matmul %38, %16, %cst_31 {dimension_numbers = #tpu.dot_dimension_numbers<[1], [0], [0], [1], [0, 0, 1, 1], [], []>} : vector<128x128xbf16>, vector<128x8xbf16>, vector<128x8xf32> -> vector<128x8xf32>
    %40 = arith.truncf %39 : vector<128x8xf32> to vector<128x8xbf16>
    %c24 = arith.constant 24 : index
    %c0_32 = arith.constant 0 : index
    %41 = vector.load %arg5[%c24, %c0_32] : memref<72x8xbf16, #tpu.memory_space<vmem>>, vector<8x8xbf16>
    %cst_33 = arith.constant dense<0.000000e+00> : vector<128x8xf32>
    %42 = tpu.matmul %40, %41, %cst_33 {dimension_numbers = #tpu.dot_dimension_numbers<[1], [0], [0], [1], [0, 0, 1, 1], [], []>} : vector<128x8xbf16>, vector<8x8xbf16>, vector<128x8xf32> -> vector<128x8xf32>
    %43 = arith.addf %36, %42 : vector<128x8xf32>
    %c4 = arith.constant 4 : index
    %c0_34 = arith.constant 0 : index
    %c0_35 = arith.constant 0 : index
    %44 = vector.load %arg11[%c4, %c0_34, %c0_35] : memref<9x128x128xbf16, #tpu.memory_space<vmem>>, vector<1x128x128xbf16>
    %45 = vector.shape_cast %44 : vector<1x128x128xbf16> to vector<128x128xbf16>
    %cst_36 = arith.constant dense<0.000000e+00> : vector<128x8xf32>
    %46 = tpu.matmul %45, %16, %cst_36 {dimension_numbers = #tpu.dot_dimension_numbers<[1], [0], [0], [1], [0, 0, 1, 1], [], []>} : vector<128x128xbf16>, vector<128x8xbf16>, vector<128x8xf32> -> vector<128x8xf32>
    %47 = arith.truncf %46 : vector<128x8xf32> to vector<128x8xbf16>
    %c32 = arith.constant 32 : index
    %c0_37 = arith.constant 0 : index
    %48 = vector.load %arg5[%c32, %c0_37] : memref<72x8xbf16, #tpu.memory_space<vmem>>, vector<8x8xbf16>
    %cst_38 = arith.constant dense<0.000000e+00> : vector<128x8xf32>
    %49 = tpu.matmul %47, %48, %cst_38 {dimension_numbers = #tpu.dot_dimension_numbers<[1], [0], [0], [1], [0, 0, 1, 1], [], []>} : vector<128x8xbf16>, vector<8x8xbf16>, vector<128x8xf32> -> vector<128x8xf32>
    %50 = arith.addf %43, %49 : vector<128x8xf32>
    %c5 = arith.constant 5 : index
    %c0_39 = arith.constant 0 : index
    %c0_40 = arith.constant 0 : index
    %51 = vector.load %arg11[%c5, %c0_39, %c0_40] : memref<9x128x128xbf16, #tpu.memory_space<vmem>>, vector<1x128x128xbf16>
    %52 = vector.shape_cast %51 : vector<1x128x128xbf16> to vector<128x128xbf16>
    %cst_41 = arith.constant dense<0.000000e+00> : vector<128x8xf32>
    %53 = tpu.matmul %52, %16, %cst_41 {dimension_numbers = #tpu.dot_dimension_numbers<[1], [0], [0], [1], [0, 0, 1, 1], [], []>} : vector<128x128xbf16>, vector<128x8xbf16>, vector<128x8xf32> -> vector<128x8xf32>
    %54 = arith.truncf %53 : vector<128x8xf32> to vector<128x8xbf16>
    %c40 = arith.constant 40 : index
    %c0_42 = arith.constant 0 : index
    %55 = vector.load %arg5[%c40, %c0_42] : memref<72x8xbf16, #tpu.memory_space<vmem>>, vector<8x8xbf16>
    %cst_43 = arith.constant dense<0.000000e+00> : vector<128x8xf32>
    %56 = tpu.matmul %54, %55, %cst_43 {dimension_numbers = #tpu.dot_dimension_numbers<[1], [0], [0], [1], [0, 0, 1, 1], [], []>} : vector<128x8xbf16>, vector<8x8xbf16>, vector<128x8xf32> -> vector<128x8xf32>
    %57 = arith.addf %50, %56 : vector<128x8xf32>
    %c6 = arith.constant 6 : index
    %c0_44 = arith.constant 0 : index
    %c0_45 = arith.constant 0 : index
    %58 = vector.load %arg11[%c6, %c0_44, %c0_45] : memref<9x128x128xbf16, #tpu.memory_space<vmem>>, vector<1x128x128xbf16>
    %59 = vector.shape_cast %58 : vector<1x128x128xbf16> to vector<128x128xbf16>
    %cst_46 = arith.constant dense<0.000000e+00> : vector<128x8xf32>
    %60 = tpu.matmul %59, %16, %cst_46 {dimension_numbers = #tpu.dot_dimension_numbers<[1], [0], [0], [1], [0, 0, 1, 1], [], []>} : vector<128x128xbf16>, vector<128x8xbf16>, vector<128x8xf32> -> vector<128x8xf32>
    %61 = arith.truncf %60 : vector<128x8xf32> to vector<128x8xbf16>
    %c48 = arith.constant 48 : index
    %c0_47 = arith.constant 0 : index
    %62 = vector.load %arg5[%c48, %c0_47] : memref<72x8xbf16, #tpu.memory_space<vmem>>, vector<8x8xbf16>
    %cst_48 = arith.constant dense<0.000000e+00> : vector<128x8xf32>
    %63 = tpu.matmul %61, %62, %cst_48 {dimension_numbers = #tpu.dot_dimension_numbers<[1], [0], [0], [1], [0, 0, 1, 1], [], []>} : vector<128x8xbf16>, vector<8x8xbf16>, vector<128x8xf32> -> vector<128x8xf32>
    %64 = arith.addf %57, %63 : vector<128x8xf32>
    %c7 = arith.constant 7 : index
    %c0_49 = arith.constant 0 : index
    %c0_50 = arith.constant 0 : index
    %65 = vector.load %arg11[%c7, %c0_49, %c0_50] : memref<9x128x128xbf16, #tpu.memory_space<vmem>>, vector<1x128x128xbf16>
    %66 = vector.shape_cast %65 : vector<1x128x128xbf16> to vector<128x128xbf16>
    %cst_51 = arith.constant dense<0.000000e+00> : vector<128x8xf32>
    %67 = tpu.matmul %66, %16, %cst_51 {dimension_numbers = #tpu.dot_dimension_numbers<[1], [0], [0], [1], [0, 0, 1, 1], [], []>} : vector<128x128xbf16>, vector<128x8xbf16>, vector<128x8xf32> -> vector<128x8xf32>
    %68 = arith.truncf %67 : vector<128x8xf32> to vector<128x8xbf16>
    %c56 = arith.constant 56 : index
    %c0_52 = arith.constant 0 : index
    %69 = vector.load %arg5[%c56, %c0_52] : memref<72x8xbf16, #tpu.memory_space<vmem>>, vector<8x8xbf16>
    %cst_53 = arith.constant dense<0.000000e+00> : vector<128x8xf32>
    %70 = tpu.matmul %68, %69, %cst_53 {dimension_numbers = #tpu.dot_dimension_numbers<[1], [0], [0], [1], [0, 0, 1, 1], [], []>} : vector<128x8xbf16>, vector<8x8xbf16>, vector<128x8xf32> -> vector<128x8xf32>
    %71 = arith.addf %64, %70 : vector<128x8xf32>
    %c8_54 = arith.constant 8 : index
    %c0_55 = arith.constant 0 : index
    %c0_56 = arith.constant 0 : index
    %72 = vector.load %arg11[%c8_54, %c0_55, %c0_56] : memref<9x128x128xbf16, #tpu.memory_space<vmem>>, vector<1x128x128xbf16>
    %73 = vector.shape_cast %72 : vector<1x128x128xbf16> to vector<128x128xbf16>
    %cst_57 = arith.constant dense<0.000000e+00> : vector<128x8xf32>
    %74 = tpu.matmul %73, %16, %cst_57 {dimension_numbers = #tpu.dot_dimension_numbers<[1], [0], [0], [1], [0, 0, 1, 1], [], []>} : vector<128x128xbf16>, vector<128x8xbf16>, vector<128x8xf32> -> vector<128x8xf32>
    %75 = arith.truncf %74 : vector<128x8xf32> to vector<128x8xbf16>
    %c64 = arith.constant 64 : index
    %c0_58 = arith.constant 0 : index
    %76 = vector.load %arg5[%c64, %c0_58] : memref<72x8xbf16, #tpu.memory_space<vmem>>, vector<8x8xbf16>
    %cst_59 = arith.constant dense<0.000000e+00> : vector<128x8xf32>
    %77 = tpu.matmul %75, %76, %cst_59 {dimension_numbers = #tpu.dot_dimension_numbers<[1], [0], [0], [1], [0, 0, 1, 1], [], []>} : vector<128x8xbf16>, vector<8x8xbf16>, vector<128x8xf32> -> vector<128x8xf32>
    %78 = arith.addf %71, %77 : vector<128x8xf32>
    %c0_60 = arith.constant 0 : index
    %c0_61 = arith.constant 0 : index
    %79 = vector.load %arg6[%c0_60, %c0_61] : memref<1x8xf32, #tpu.memory_space<vmem>>, vector<1x8xf32>
    %80 = vector.broadcast %79 : vector<1x8xf32> to vector<128x8xf32>
    %81 = arith.addf %78, %80 : vector<128x8xf32>
    %cst_62 = arith.constant 0.000000e+00 : f32
    %82 = vector.broadcast %cst_62 : f32 to vector<128x8xf32>
    %83 = arith.maximumf %81, %82 : vector<128x8xf32>
    %84 = arith.truncf %83 : vector<128x8xf32> to vector<128x8xbf16>
    %c0_63 = arith.constant 0 : index
    %c0_64 = arith.constant 0 : index
    %85 = vector.load %arg7[%c0_63, %c0_64] : memref<8x32xbf16, #tpu.memory_space<vmem>>, vector<8x32xbf16>
    %cst_65 = arith.constant dense<0.000000e+00> : vector<128x32xf32>
    %86 = tpu.matmul %84, %85, %cst_65 {dimension_numbers = #tpu.dot_dimension_numbers<[1], [0], [0], [1], [0, 0, 1, 1], [], []>} : vector<128x8xbf16>, vector<8x32xbf16>, vector<128x32xf32> -> vector<128x32xf32>
    %c0_66 = arith.constant 0 : index
    %c0_67 = arith.constant 0 : index
    %87 = vector.load %arg8[%c0_66, %c0_67] : memref<1x32xf32, #tpu.memory_space<vmem>>, vector<1x32xf32>
    %88 = vector.broadcast %87 : vector<1x32xf32> to vector<128x32xf32>
    %89 = arith.addf %86, %88 : vector<128x32xf32>
    %90 = arith.truncf %7 : vector<128x16xf32> to vector<128x16xbf16>
    %c0_68 = arith.constant 0 : index
    %c0_69 = arith.constant 0 : index
    %91 = vector.load %arg9[%c0_68, %c0_69] : memref<16x32xbf16, #tpu.memory_space<vmem>>, vector<16x32xbf16>
    %cst_70 = arith.constant dense<0.000000e+00> : vector<128x32xf32>
    %92 = tpu.matmul %90, %91, %cst_70 {dimension_numbers = #tpu.dot_dimension_numbers<[1], [0], [0], [1], [0, 0, 1, 1], [], []>} : vector<128x16xbf16>, vector<16x32xbf16>, vector<128x32xf32> -> vector<128x32xf32>
    %c0_71 = arith.constant 0 : index
    %c0_72 = arith.constant 0 : index
    %93 = vector.load %arg10[%c0_71, %c0_72] : memref<1x32xf32, #tpu.memory_space<vmem>>, vector<1x32xf32>
    %94 = vector.broadcast %93 : vector<1x32xf32> to vector<128x32xf32>
    %95 = arith.addf %92, %94 : vector<128x32xf32>
    %96 = arith.addf %89, %95 : vector<128x32xf32>
    %cst_73 = arith.constant 0.000000e+00 : f32
    %97 = vector.broadcast %cst_73 : f32 to vector<128x32xf32>
    %98 = arith.maximumf %96, %97 : vector<128x32xf32>
    %c0_74 = arith.constant 0 : index
    %c0_75 = arith.constant 0 : index
    %99 = vector.load %arg12[%c0_74, %c0_75] : memref<2x128xf32, #tpu.memory_space<vmem>>, vector<2x128xf32>
    %cst_76 = arith.constant dense<0.000000e+00> : vector<2x32xf32>
    %100 = tpu.matmul %99, %98, %cst_76 {dimension_numbers = #tpu.dot_dimension_numbers<[1], [0], [0], [1], [0, 0, 1, 1], [], []>} : vector<2x128xf32>, vector<128x32xf32>, vector<2x32xf32> -> vector<2x32xf32>
    %101 = arith.truncf %100 : vector<2x32xf32> to vector<2x32xbf16>
    %c0_77 = arith.constant 0 : index
    %c0_78 = arith.constant 0 : index
    %102 = vector.load %arg13[%c0_77, %c0_78] : memref<32x128xbf16, #tpu.memory_space<vmem>>, vector<32x128xbf16>
    %cst_79 = arith.constant dense<0.000000e+00> : vector<2x128xf32>
    %103 = tpu.matmul %101, %102, %cst_79 {dimension_numbers = #tpu.dot_dimension_numbers<[1], [0], [0], [1], [0, 0, 1, 1], [], []>} : vector<2x32xbf16>, vector<32x128xbf16>, vector<2x128xf32> -> vector<2x128xf32>
    %c0_80 = arith.constant 0 : index
    %c0_81 = arith.constant 0 : index
    %104 = vector.load %arg14[%c0_80, %c0_81] : memref<1x128xf32, #tpu.memory_space<vmem>>, vector<1x128xf32>
    %105 = vector.broadcast %104 : vector<1x128xf32> to vector<2x128xf32>
    %106 = arith.addf %103, %105 : vector<2x128xf32>
    %107 = arith.truncf %106 : vector<2x128xf32> to vector<2x128xbf16>
    %c0_82 = arith.constant 0 : index
    %c0_83 = arith.constant 0 : index
    %108 = vector.load %arg15[%c0_82, %c0_83] : memref<128x512xbf16, #tpu.memory_space<vmem>>, vector<128x512xbf16>
    %cst_84 = arith.constant dense<0.000000e+00> : vector<2x512xf32>
    %109 = tpu.matmul %107, %108, %cst_84 {dimension_numbers = #tpu.dot_dimension_numbers<[1], [0], [0], [1], [0, 0, 1, 1], [], []>} : vector<2x128xbf16>, vector<128x512xbf16>, vector<2x512xf32> -> vector<2x512xf32>
    %c0_85 = arith.constant 0 : index
    %c0_86 = arith.constant 0 : index
    %110 = vector.load %arg16[%c0_85, %c0_86] : memref<1x512xf32, #tpu.memory_space<vmem>>, vector<1x512xf32>
    %111 = vector.broadcast %110 : vector<1x512xf32> to vector<2x512xf32>
    %112 = arith.addf %109, %111 : vector<2x512xf32>
    %cst_87 = arith.constant 0.000000e+00 : f32
    %113 = vector.broadcast %cst_87 : f32 to vector<2x512xf32>
    %114 = arith.maximumf %112, %113 : vector<2x512xf32>
    %115 = arith.truncf %114 : vector<2x512xf32> to vector<2x512xbf16>
    %c0_88 = arith.constant 0 : index
    %c0_89 = arith.constant 0 : index
    %116 = vector.load %arg17[%c0_88, %c0_89] : memref<512x128xbf16, #tpu.memory_space<vmem>>, vector<512x128xbf16>
    %cst_90 = arith.constant dense<0.000000e+00> : vector<2x128xf32>
    %117 = tpu.matmul %115, %116, %cst_90 {dimension_numbers = #tpu.dot_dimension_numbers<[1], [0], [0], [1], [0, 0, 1, 1], [], []>} : vector<2x512xbf16>, vector<512x128xbf16>, vector<2x128xf32> -> vector<2x128xf32>
    %c0_91 = arith.constant 0 : index
    %c0_92 = arith.constant 0 : index
    %118 = vector.load %arg18[%c0_91, %c0_92] : memref<1x128xf32, #tpu.memory_space<vmem>>, vector<1x128xf32>
    %119 = vector.broadcast %118 : vector<1x128xf32> to vector<2x128xf32>
    %120 = arith.addf %117, %119 : vector<2x128xf32>
    %121 = arith.mulf %106, %106 : vector<2x128xf32>
    %cst_93 = arith.constant dense<0.000000e+00> : vector<2xf32>
    %122 = vector.multi_reduction <add>, %121, %cst_93 [1] : vector<2x128xf32> to vector<2xf32>
    %123 = vector.shape_cast %122 : vector<2xf32> to vector<2x1xf32>
    %cst_94 = arith.constant 1.000000e-24 : f32
    %124 = vector.broadcast %cst_94 : f32 to vector<2x1xf32>
    %125 = arith.maximumf %123, %124 : vector<2x1xf32>
    %126 = math.rsqrt %125 : vector<2x1xf32>
    %127 = vector.broadcast %126 : vector<2x1xf32> to vector<2x128xf32>
    %128 = arith.mulf %106, %127 : vector<2x128xf32>
    %c0_95 = arith.constant 0 : index
    %c0_96 = arith.constant 0 : index
    %129 = vector.load %arg19[%c0_95, %c0_96] : memref<2x128xf32, #tpu.memory_space<vmem>>, vector<2x128xf32>
    tpu.vector_store %arg19[%c0_95, %c0_96], %128 {strides = array<i32>} : memref<2x128xf32, #tpu.memory_space<vmem>>, vector<2x128xf32>,
    %130 = arith.mulf %120, %120 : vector<2x128xf32>
    %cst_97 = arith.constant dense<0.000000e+00> : vector<2xf32>
    %131 = vector.multi_reduction <add>, %130, %cst_97 [1] : vector<2x128xf32> to vector<2xf32>
    %132 = vector.shape_cast %131 : vector<2xf32> to vector<2x1xf32>
    %cst_98 = arith.constant 1.000000e-24 : f32
    %133 = vector.broadcast %cst_98 : f32 to vector<2x1xf32>
    %134 = arith.maximumf %132, %133 : vector<2x1xf32>
    %135 = math.rsqrt %134 : vector<2x1xf32>
    %136 = vector.broadcast %135 : vector<2x1xf32> to vector<2x128xf32>
    %137 = arith.mulf %120, %136 : vector<2x128xf32>
    %c0_99 = arith.constant 0 : index
    %c0_100 = arith.constant 0 : index
    %138 = vector.load %arg20[%c0_99, %c0_100] : memref<2x128xf32, #tpu.memory_space<vmem>>, vector<2x128xf32>
    tpu.vector_store %arg20[%c0_99, %c0_100], %137 {strides = array<i32>} : memref<2x128xf32, #tpu.memory_space<vmem>>, vector<2x128xf32>,
    return
  }
}

</mosaic_0001>

<bundles_post_ra>
// kernel: simclr_stage1_forward.1
= control target key start
LH: loop header
LB: loop body
LE: loop exit
PB: predicated region body
PF: predicated region fallthrough
CT: control target
= control target key end

     0   :  { %s7127_s0 = inlined_call_operand.vmem [shape: bf16[128,32], index: 0, kind: input, shape index: {}]   ;;  %s7128_s1 = inlined_call_operand.vmem [shape: bf16[32,16], index: 1, kind: input, shape index: {}]   ;;  %s7129_s2 = inlined_call_operand.vmem [shape: f32[1,16], index: 2, kind: input, shape index: {}]   ;;  %s7130_s3 = inlined_call_operand.vmem [shape: bf16[16,8], index: 3, kind: input, shape index: {}]   ;;  %s7131_s4 = inlined_call_operand.vmem [shape: f32[1,8], index: 4, kind: input, shape index: {}]   ;;  %s7132_s5 = inlined_call_operand.vmem [shape: bf16[72,8], index: 5, kind: input, shape index: {}]   ;;  %s7133_s6 = inlined_call_operand.vmem [shape: f32[1,8], index: 6, kind: input, shape index: {}]   ;;  %s7134_s7 = inlined_call_operand.vmem [shape: bf16[8,32], index: 7, kind: input, shape index: {}]   ;;  %s7135_s8 = inlined_call_operand.vmem [shape: f32[1,32], index: 8, kind: input, shape index: {}]   ;;  %s7136_s9 = inlined_call_operand.vmem [shape: bf16[16,32], index: 9, kind: input, shape index: {}]   ;;  %s7137_s10 = inlined_call_operand.vmem [shape: f32[1,32], index: 10, kind: input, shape index: {}]   ;;  %s7138_s11 = inlined_call_operand.vmem [shape: bf16[9,128,128], index: 11, kind: input, shape index: {}]   ;;  %s7139_s12 = inlined_call_operand.vmem [shape: f32[2,128], index: 12, kind: input, shape index: {}]   ;;  %s7140_s13 = inlined_call_operand.vmem [shape: bf16[32,128], index: 13, kind: input, shape index: {}]   ;;  %s7141_s14 = inlined_call_operand.vmem [shape: f32[1,128], index: 14, kind: input, shape index: {}]   ;;  %s7142_s15 = inlined_call_operand.vmem [shape: bf16[128,512], index: 15, kind: input, shape index: {}]   ;;  %s7143_s16 = inlined_call_operand.vmem [shape: f32[1,512], index: 16, kind: input, shape index: {}]   ;;  %s7144_s17 = inlined_call_operand.vmem [shape: bf16[512,128], index: 17, kind: input, shape index: {}]   ;;  %s7145_s18 = inlined_call_operand.vmem [shape: f32[1,128], index: 18, kind: input, shape index: {}]   ;;  %s7146_s19 = inlined_call_operand.hbm [shape: f32[2,128], index: 19, kind: output, shape index: {0}]   ;;  %s7147_s20 = inlined_call_operand.hbm [shape: f32[2,128], index: 20, kind: output, shape index: {1}]  }
   0x1   :  { %7150 = sst [smem:[#allocation8_spill]] %s7127_s0 }
   0x2   :  { %7151 = sst [smem:[#allocation9_spill]] %s7128_s1 }
   0x3   :  { %7152 = sst [smem:[#allocation10_spill]] %s7129_s2 }
   0x4   :  { %7153 = sst [smem:[#allocation11_spill]] %s7130_s3 }
   0x5   :  { %7154 = sst [smem:[#allocation12_spill]] %s7131_s4 }
   0x6   :  { %26 = vsyncpa [#allocation3], 0  ;;  %s7155_s23 = sld [smem:[#allocation9_spill]]  ;;  %vm146_vm0 = vcmask 261120   ;;  %s7156_s26 = sld [smem:[#allocation8_spill]] }
   0xc   :  { %v5874_v0 = vld [vmem:[%s7155_s23] sm:$0xff]   ;;  %v5875_v1 = vld [vmem:[%s7155_s23 + $0x8] sm:$0xff]   ;;  %v5878_v4 = vld [vmem:[%s7156_s26 + $0x10] sm:$0xff]  }
   0xd   :  { %5091 = vmatprep.subr.bf16.mxu0 %v5874_v0  ;;  %v5876_v2 = vld [vmem:[%s7156_s26] sm:$0xff]   ;;  %v5877_v3 = vld [vmem:[%s7156_s26 + $0x8] sm:$0xff]   ;;  %v5879_v5 = vld [vmem:[%s7156_s26 + $0x18] sm:$0xff]  }
   0xe   :  { %5092 = vmatpush3.bf16.msra.mxu0 %v5874_v0  ;;  %5095 = vmatprep.mubr.msk.bf16.mxu0 %vm146_vm0, %v5876_v2  ;;  %v5880_v6 = vld [vmem:[%s7156_s26 + $0x20] sm:$0xff]   ;;  %v5881_v7 = vld [vmem:[%s7156_s26 + $0x28] sm:$0xff]   ;;  %v5882_v8 = vld [vmem:[%s7156_s26 + $0x30] sm:$0xff]  }
   0xf   :  { %5093 = vmatprep.subr.bf16.mxu0 %v5875_v1  ;;  %v5883_v9 = vld [vmem:[%s7156_s26 + $0x38] sm:$0xff]  }
  0x12   :  { %5094 = vmatpush3.bf16.msra.mxu0 %v5875_v1 }
  0x15   :  { %5096 = vmatmul.mubr.msk.bf16.vlgmr.msra.gmra.mrb[0].mxu0 %vm146_vm0, %v5877_v3 }
  0x16   :  { %5099 = vmatprep.mubr.msk.bf16.mxu0 %vm146_vm0, %v5878_v4 }
  0x1d   :  { %5100 = vmatmul.mubr.msk.bf16.gmra.mrb[4].mxu0 %vm146_vm0, %v5879_v5 }
  0x1e   :  { %5103 = vmatprep.mubr.msk.bf16.mxu0 %vm146_vm0, %v5880_v6 }
  0x25   :  { %5104 = vmatmul.mubr.msk.bf16.gmra.mrb[8].mxu0 %vm146_vm0, %v5881_v7 }
  0x26   :  { %5107 = vmatprep.mubr.msk.bf16.mxu0 %vm146_vm0, %v5882_v8 }
  0x2d   :  { %5108 = vmatmul.mubr.msk.bf16.gmra.mrb[12].mxu0 %vm146_vm0, %v5883_v9 }
  0x2e   :  { %27 = vsyncpa [#allocation5], 0  ;;  %s7157_s4 = sld [smem:[#allocation11_spill]]  ;;  %s7158_s0 = sld [smem:[#allocation10_spill]]  ;;  %vm307_vm1 = vcmask 130048   ;;  %v5885_v4 = vld [vmem:[%s7138_s11 + $0x40] sm:$0xff]  }
  0x2f   :  { %5177 = vmatprep.mubr.bf16.mxu0 %v5885_v4  ;;  %v5893_v5 = vld [vmem:[%s7138_s11] sm:$0xff]   ;;  %s7159_s2 = sld [smem:[#allocation12_spill]]  ;;  %vm819_vm2 = vcmask 1043456   ;;  %vm794_vm3 = vcmask 64512   ;;  %vm6093_vm4 = vmmov 0   ;;  %vm4331_vm5 = vcmask 1041408  }
  0x30   :  { %s6096_s30 = smov [#allocation2]  }
  0x34   :  { %v5884_v10 = vld [vmem:[%s7157_s4] sm:$0xff]  }
  0x35   :  { %5111 = vmatprep.subr.bf16.mxu1 %v5884_v10  ;;  %v4375_v11 = vld [vmem:[%s7158_s0] ss:$0 sm:$0xff] }
  0x36   :  { %5112 = vmatpush3.bf16.msra.mxu1 %v5884_v10  ;;  %v6288_v6 = vld [vmem:[%s7159_s2] ss:$0 sm:$0xff] }
  0xe8   :  { %v5097_v12 = vpop.f32.mrb[0].mxu0 }
  0xe9   :  { %v214_v13 = vadd.f32 %v5097_v12, %v4375_v11  ;;  %v205_v14 = vpop.f32.mrb[1].mxu0 }
  0xea   :  { %v206_v15 = vadd.f32 %v4375_v11, %v205_v14  ;;  %v5098_v16 = vpop.f32.mrb[2].mxu0 }
  0xeb   :  { %v217_v17 = vadd.f32 %v5098_v16, %v4375_v11  ;;  %v208_v18 = vpop.f32.mrb[3].mxu0  ;;  %v270_v20 = vmax.f32 %v214_v13, 0.0 }
  0xec   :  { %v209_v19 = vadd.f32 %v4375_v11, %v208_v18  ;;  %v268_v22 = vmax.f32 %v206_v15, 0.0 }
  0xed   :  { %v271_v21 = vmax.f32 %v217_v17, 0.0 }
  0xee   :  { %v269_v23 = vmax.f32 %v209_v19, 0.0 }
  0xef   :  { %v6247_v24 = vpack.c.bf16 %v271_v21, %v270_v20 }
  0xf0   :  { %v5101_v25 = vpop.f32.mrb[4].mxu0  ;;  %v6249_v26 = vpack.c.bf16 %v269_v23, %v268_v22 }
  0xf1   :  { %v230_v27 = vadd.f32 %v5101_v25, %v4375_v11  ;;  %v221_v28 = vpop.f32.mrb[5].mxu0 }
  0xf2   :  { %v222_v29 = vadd.f32 %v4375_v11, %v221_v28  ;;  %v5102_v30 = vpop.f32.mrb[6].mxu0  ;;  %5113 = vmatprep.mubr.msk.bf16.mxu1 %vm307_vm1, %v6249_v26 }
  0xf3   :  { %v233_v31 = vadd.f32 %v5102_v30, %v4375_v11  ;;  %v224_v32 = vpop.f32.mrb[7].mxu0  ;;  %5114 = vmatmul.mubr.msk.bf16.vlgmr.msra.gmra.mrb[0].mxu1 %vm307_vm1, %v6247_v24  ;;  %v274_v34 = vmax.f32 %v230_v27, 0.0 }
  0xf4   :  { %v225_v33 = vadd.f32 %v4375_v11, %v224_v32  ;;  %v272_v36 = vmax.f32 %v222_v29, 0.0 }
  0xf5   :  { %v275_v35 = vmax.f32 %v233_v31, 0.0 }
  0xf6   :  { %v273_v37 = vmax.f32 %v225_v33, 0.0 }
  0xf7   :  { %v6255_v38 = vpack.c.bf16 %v275_v35, %v274_v34 }
  0xf8   :  { %v6257_v39 = vpack.c.bf16 %v273_v37, %v272_v36  ;;  %v5105_v40 = vpop.f32.mrb[8].mxu0 }
  0xf9   :  { %v246_v41 = vadd.f32 %v5105_v40, %v4375_v11  ;;  %v237_v42 = vpop.f32.mrb[9].mxu0 }
  0xfa   :  { %v238_v43 = vadd.f32 %v4375_v11, %v237_v42  ;;  %v5106_v44 = vpop.f32.mrb[10].mxu0  ;;  %5117 = vmatprep.mubr.msk.bf16.mxu1 %vm307_vm1, %v6257_v39 }
  0xfb   :  { %v249_v45 = vadd.f32 %v5106_v44, %v4375_v11  ;;  %v240_v46 = vpop.f32.mrb[11].mxu0  ;;  %5118 = vmatmul.mubr.msk.bf16.gmra.mrb[4].mxu1 %vm307_vm1, %v6255_v38  ;;  %v278_v48 = vmax.f32 %v246_v41, 0.0 }
  0xfc   :  { %v241_v47 = vadd.f32 %v4375_v11, %v240_v46  ;;  %v276_v50 = vmax.f32 %v238_v43, 0.0 }
  0xfd   :  { %v279_v49 = vmax.f32 %v249_v45, 0.0 }
  0xfe   :  { %v277_v51 = vmax.f32 %v241_v47, 0.0 }
  0xff   :  { %v6263_v52 = vpack.c.bf16 %v279_v49, %v278_v48 }
 0x100   :  { %v6265_v53 = vpack.c.bf16 %v277_v51, %v276_v50  ;;  %v5109_v54 = vpop.f32.mrb[12].mxu0 }
 0x101   :  { %v262_v55 = vadd.f32 %v5109_v54, %v4375_v11  ;;  %v253_v56 = vpop.f32.mrb[13].mxu0 }
 0x102   :  { %v254_v57 = vadd.f32 %v4375_v11, %v253_v56  ;;  %v5110_v58 = vpop.f32.mrb[14].mxu0  ;;  %5121 = vmatprep.mubr.msk.bf16.mxu1 %vm307_vm1, %v6265_v53 }
 0x103   :  { %v265_v59 = vadd.f32 %v5110_v58, %v4375_v11  ;;  %v256_v60 = vpop.f32.mrb[15].mxu0  ;;  %5122 = vmatmul.mubr.msk.bf16.gmra.mrb[8].mxu1 %vm307_vm1, %v6263_v52  ;;  %v282_v62 = vmax.f32 %v262_v55, 0.0 }
 0x104   :  { %v257_v61 = vadd.f32 %v4375_v11, %v256_v60  ;;  %v280_v0 = vmax.f32 %v254_v57, 0.0 }
 0x105   :  { %v283_v63 = vmax.f32 %v265_v59, 0.0 }
 0x106   :  { %v281_v1 = vmax.f32 %v257_v61, 0.0 }
 0x107   :  { %v6271_v2 = vpack.c.bf16 %v283_v63, %v282_v62 }
 0x108   :  { %v6273_v3 = vpack.c.bf16 %v281_v1, %v280_v0 }
 0x10a   :  { %5125 = vmatprep.mubr.msk.bf16.mxu1 %vm307_vm1, %v6273_v3 }
 0x10b   :  { %5126 = vmatmul.mubr.msk.bf16.gmra.mrb[12].mxu1 %vm307_vm1, %v6271_v2 }
 0x10c   :  { %5145 = vmatprep.mubr.bf16.mxu1 %v5893_v5 }
 0x1c6   :  { %v5115_v7 = vpop.f32.mrb[0].mxu1 }
 0x1c7   :  { %v375_v8 = vadd.f32 %v5115_v7, %v6288_v6  ;;  %v366_v9 = vpop.f32.mrb[1].mxu1 }
 0x1c8   :  { %v367_v10 = vadd.f32 %v6288_v6, %v366_v9  ;;  %v5116_v11 = vpop.f32.mrb[2].mxu1  ;;  %v5887_v9 = vld [vmem:[%s7138_s11 + $0x50] sm:$0xff]  }
 0x1c9   :  { %v378_v12 = vadd.f32 %v5116_v11, %v6288_v6  ;;  %v369_v13 = vpop.f32.mrb[3].mxu1  ;;  %v431_v15 = vmax.f32 %v375_v8, 0.0  ;;  %v5894_v8 = vld [vmem:[%s7138_s11 + $0x8] sm:$0xff]   ;;  %v5888_v11 = vld [vmem:[%s7138_s11 + $0x58] sm:$0xff]  }
 0x1ca   :  { %v370_v14 = vadd.f32 %v6288_v6, %v369_v13  ;;  %v429_v17 = vmax.f32 %v367_v10, 0.0  ;;  %v5897_v10 = vld [vmem:[%s7138_s11 + $0x10] sm:$0xff]   ;;  %v5889_v13 = vld [vmem:[%s7138_s11 + $0x60] sm:$0xff]  }
 0x1cb   :  { %v432_v16 = vmax.f32 %v378_v12, 0.0  ;;  %v5898_v12 = vld [vmem:[%s7138_s11 + $0x18] sm:$0xff]  }
 0x1cc   :  { %v430_v18 = vmax.f32 %v370_v14, 0.0  ;;  %v5901_v14 = vld [vmem:[%s7138_s11 + $0x20] sm:$0xff]  }
 0x1cd   :  { %v6294_v19 = vpack.c.bf16 %v432_v16, %v431_v15  ;;  %v5890_v15 = vld [vmem:[%s7138_s11 + $0x68] sm:$0xff]  }
 0x1ce   :  { %v6296_v20 = vpack.c.bf16 %v430_v18, %v429_v17  ;;  %v5119_v21 = vpop.f32.mrb[4].mxu1  ;;  %v5902_v16 = vld [vmem:[%s7138_s11 + $0x28] sm:$0xff]   ;;  %v5891_v17 = vld [vmem:[%s7138_s11 + $0x70] sm:$0xff]  }
 0x1cf   :  { %v391_v22 = vadd.f32 %v5119_v21, %v6288_v6  ;;  %v382_v23 = vpop.f32.mrb[5].mxu1  ;;  %v5905_v18 = vld [vmem:[%s7138_s11 + $0x30] sm:$0xff]   ;;  %v5892_v21 = vld [vmem:[%s7138_s11 + $0x78] sm:$0xff]  }
 0x1d0   :  { %v383_v25 = vadd.f32 %v6288_v6, %v382_v23  ;;  %v5120_v27 = vpop.f32.mrb[6].mxu1  ;;  %5129 = vmatprep.subr.bf16.mxu1 %v6296_v20  ;;  %5161 = vmatprep.subr.bf16.mxu0 %v6296_v20  ;;  %v5895_v23 = vld [vmem:[%s7138_s11 + $0x80] sm:$0xff]  }
 0x1d1   :  { %v394_v28 = vadd.f32 %v5120_v27, %v6288_v6  ;;  %v385_v29 = vpop.f32.mrb[7].mxu1  ;;  %5130 = vmatpush3.bf16.msra.mxu1 %v6296_v20  ;;  %5162 = vmatpush3.bf16.msra.mxu0 %v6296_v20  ;;  %v435_v31 = vmax.f32 %v391_v22, 0.0  ;;  %v5906_v22 = vld [vmem:[%s7138_s11 + $0x38] sm:$0xff]   ;;  %v5899_v27 = vld [vmem:[%s7138_s11 + $0x90] sm:$0xff]  }
 0x1d2   :  { %v386_v30 = vadd.f32 %v6288_v6, %v385_v29  ;;  %5131 = vmatprep.subr.bf16.mxu1 %v6294_v19  ;;  %5163 = vmatprep.subr.bf16.mxu0 %v6294_v19  ;;  %v433_v33 = vmax.f32 %v383_v25, 0.0  ;;  %v5896_v25 = vld [vmem:[%s7138_s11 + $0x88] sm:$0xff]   ;;  %v5903_v29 = vld [vmem:[%s7138_s11 + $0xa0] sm:$0xff]  }
 0x1d3   :  { %v436_v32 = vmax.f32 %v394_v28, 0.0  ;;  %v5900_v28 = vld [vmem:[%s7138_s11 + $0x98] sm:$0xff]  }
 0x1d4   :  { %v434_v34 = vmax.f32 %v386_v30, 0.0  ;;  %v5904_v30 = vld [vmem:[%s7138_s11 + $0xa8] sm:$0xff]  }
 0x1d5   :  { %v6308_v35 = vpack.c.bf16 %v436_v32, %v435_v31  ;;  %5132 = vmatpush3.bf16.msra.mxu1 %v6294_v19  ;;  %5164 = vmatpush3.bf16.msra.mxu0 %v6294_v19  ;;  %v5907_v31 = vld [vmem:[%s7138_s11 + $0xb0] sm:$0xff]   ;;  %v5908_v32 = vld [vmem:[%s7138_s11 + $0xb8] sm:$0xff]  }
 0x1d6   :  { %v6312_v36 = vpack.c.bf16 %v434_v34, %v433_v33  ;;  %v5123_v37 = vpop.f32.mrb[8].mxu1  ;;  %v5909_v33 = vld [vmem:[%s7138_s11 + $0xc0] sm:$0xff]  }
 0x1d7   :  { %v407_v40 = vadd.f32 %v5123_v37, %v6288_v6  ;;  %v398_v41 = vpop.f32.mrb[9].mxu1  ;;  %v793_v34 = vld [vmem:[%s7132_s5 + $0x4] sm:$0xf] }
 0x1d8   :  { %v399_v42 = vadd.f32 %v6288_v6, %v398_v41  ;;  %v5124_v43 = vpop.f32.mrb[10].mxu1  ;;  %5133 = vmatprep.subr.bf16.mxu1 %v6312_v36  ;;  %5165 = vmatprep.subr.bf16.mxu0 %v6312_v36  ;;  %v821_v37 = vsel %vm819_vm2, %v793_v34, 0  ;;  %v5911_v41 = vld [vmem:[%s7138_s11 + $0xd0] sm:$0xff]  }
 0x1d9   :  { %v410_v44 = vadd.f32 %v5124_v43, %v6288_v6  ;;  %v401_v45 = vpop.f32.mrb[11].mxu1  ;;  %5134 = vmatpush3.bf16.msra.mxu1 %v6312_v36  ;;  %5166 = vmatpush3.bf16.msra.mxu0 %v6312_v36  ;;  %v439_v47 = vmax.f32 %v407_v40, 0.0  ;;  %v5910_v40 = vld [vmem:[%s7138_s11 + $0xc8] sm:$0xff]   ;;  %v5913_v43 = vld [vmem:[%s7138_s11 + $0xe0] sm:$0xff]  }
 0x1da   :  { %v402_v46 = vadd.f32 %v6288_v6, %v401_v45  ;;  %5135 = vmatprep.subr.bf16.mxu1 %v6308_v35  ;;  %5167 = vmatprep.subr.bf16.mxu0 %v6308_v35  ;;  %v437_v49 = vmax.f32 %v399_v42, 0.0  ;;  %v5912_v42 = vld [vmem:[%s7138_s11 + $0xd8] sm:$0xff]   ;;  %v5915_v45 = vld [vmem:[%s7138_s11 + $0xf0] sm:$0xff]  }
 0x1db   :  { %v440_v48 = vmax.f32 %v410_v44, 0.0  ;;  %v5914_v44 = vld [vmem:[%s7138_s11 + $0xe8] sm:$0xff]  }
 0x1dc   :  { %v438_v50 = vmax.f32 %v402_v46, 0.0  ;;  %v5916_v46 = vld [vmem:[%s7138_s11 + $0xf8] sm:$0xff]  }
 0x1dd   :  { %v6324_v51 = vpack.c.bf16 %v440_v48, %v439_v47  ;;  %5136 = vmatpush3.bf16.msra.mxu1 %v6308_v35  ;;  %5168 = vmatpush3.bf16.msra.mxu0 %v6308_v35  ;;  %v5917_v47 = vld [vmem:[%s7138_s11 + $0x100] sm:$0xff]  }
 0x1de   :  { %v6328_v54 = vpack.c.bf16 %v438_v50, %v437_v49  ;;  %v5127_v55 = vpop.f32.mrb[12].mxu1  ;;  %v6502_v48 = vld [vmem:[%s7132_s5] sm:$0xf]  ;;  %v5918_v49 = vld [vmem:[%s7138_s11 + $0x108] sm:$0xff]   ;;  %v5919_v50 = vld [vmem:[%s7138_s11 + $0x110] sm:$0xff]  }
 0x1df   :  { %v423_v56 = vadd.f32 %v5127_v55, %v6288_v6  ;;  %v414_v57 = vpop.f32.mrb[13].mxu1  ;;  %v5920_v55 = vld [vmem:[%s7138_s11 + $0x118] sm:$0xff]  }
 0x1e0   :  { %v415_v58 = vadd.f32 %v6288_v6, %v414_v57  ;;  %v5128_v59 = vpop.f32.mrb[14].mxu1  ;;  %5137 = vmatprep.subr.bf16.mxu1 %v6328_v54  ;;  %5169 = vmatprep.subr.bf16.mxu0 %v6328_v54  ;;  %v5922_v57 = vld [vmem:[%s7138_s11 + $0x128] sm:$0xff]  }
 0x1e1   :  { %v426_v60 = vadd.f32 %v5128_v59, %v6288_v6  ;;  %v417_v61 = vpop.f32.mrb[15].mxu1  ;;  %5138 = vmatpush3.bf16.msra.mxu1 %v6328_v54  ;;  %5170 = vmatpush3.bf16.msra.mxu0 %v6328_v54  ;;  %v443_v63 = vmax.f32 %v423_v56, 0.0  ;;  %v5921_v56 = vld [vmem:[%s7138_s11 + $0x120] sm:$0xff]   ;;  %v5924_v59 = vld [vmem:[%s7138_s11 + $0x138] sm:$0xff]  }
 0x1e2   :  { %v418_v62 = vadd.f32 %v6288_v6, %v417_v61  ;;  %5139 = vmatprep.subr.bf16.mxu1 %v6324_v51  ;;  %5171 = vmatprep.subr.bf16.mxu0 %v6324_v51  ;;  %v441_v1 = vmax.f32 %v415_v58, 0.0  ;;  %v5886_v6 = vld [vmem:[%s7138_s11 + $0x48] sm:$0xff]   ;;  %v5923_v58 = vld [vmem:[%s7138_s11 + $0x130] sm:$0xff]  }
 0x1e3   :  { %v444_v0 = vmax.f32 %v426_v60, 0.0  ;;  %v5925_v60 = vld [vmem:[%s7138_s11 + $0x140] sm:$0xff]   ;;  %v5926_v61 = vld [vmem:[%s7138_s11 + $0x148] sm:$0xff]  }
 0x1e4   :  { %v442_v4 = vmax.f32 %v418_v62, 0.0  ;;  %v5927_v62 = vld [vmem:[%s7138_s11 + $0x150] sm:$0xff]  }
 0x1e5   :  { %v6340_v5 = vpack.c.bf16 %v444_v0, %v443_v63  ;;  %5140 = vmatpush3.bf16.msra.mxu1 %v6324_v51  ;;  %5172 = vmatpush3.bf16.msra.mxu0 %v6324_v51  ;;  %v5928_v63 = vld [vmem:[%s7138_s11 + $0x158] sm:$0xff]   ;;  %v5929_v0 = vld [vmem:[%s7138_s11 + $0x160] sm:$0xff]  }
 0x1e6   :  { %v6344_v7 = vpack.c.bf16 %v442_v4, %v441_v1  ;;  %v5930_v1 = vld [vmem:[%s7138_s11 + $0x168] sm:$0xff]   ;;  %v5931_v4 = vld [vmem:[%s7138_s11 + $0x170] sm:$0xff]  }
 0x1e8   :  { %5141 = vmatprep.subr.bf16.mxu1 %v6344_v7  ;;  %5173 = vmatprep.subr.bf16.mxu0 %v6344_v7 }
 0x1e9   :  { %5142 = vmatpush3.bf16.msra.mxu1 %v6344_v7  ;;  %5174 = vmatpush3.bf16.msra.mxu0 %v6344_v7 }
 0x1ea   :  { %5143 = vmatprep.subr.bf16.mxu1 %v6340_v5  ;;  %5175 = vmatprep.subr.bf16.mxu0 %v6340_v5 }
 0x1ed   :  { %5144 = vmatpush3.bf16.msra.mxu1 %v6340_v5  ;;  %5176 = vmatpush3.bf16.msra.mxu0 %v6340_v5 }
 0x1ee   :  { %5229 = vmatprep.subr.bf16.mxu0 %v6296_v20  ;;  %5858 = vmatprep.subr.msk.bf16.mxu1 %vm819_vm2, %v793_v34 }
 0x1f0   :  { %5178 = vmatmul.mubr.bf16.vlgmr.msra.gmra.mrb[16].mxu0 %v5886_v6  ;;  %5146 = vmatmul.mubr.bf16.vlgmr.msra.gmra.mrb[16].mxu1 %v5894_v8  ;;  %v5932_v6 = vld [vmem:[%s7138_s11 + $0x178] sm:$0xff]   ;;  %v5933_v8 = vld [vmem:[%s7138_s11 + $0x180] sm:$0xff]  }
 0x1f1   :  { %5230 = vmatpush3.bf16.msra.mxu0 %v6296_v20  ;;  %5181 = vmatprep.mubr.bf16.mxu0 %v5887_v9  ;;  %v5934_v9 = vld [vmem:[%s7138_s11 + $0x188] sm:$0xff]  }
 0x1f2   :  { %5231 = vmatprep.subr.bf16.mxu0 %v6294_v19  ;;  %5149 = vmatprep.mubr.bf16.mxu1 %v5897_v10  ;;  %v5935_v10 = vld [vmem:[%s7138_s11 + $0x190] sm:$0xff]  }
 0x1f3   :  { %5194 = vmatpush3.bf16.msra.mxu1 %v821_v37  ;;  %v945_v37 = vsel %vm819_vm2, %v6502_v48, 0 }
 0x1f4   :  { %5859 = vmatprep.subr.msk.bf16.mxu1 %vm819_vm2, %v6502_v48 }
 0x1f5   :  { %5232 = vmatpush3.bf16.msra.mxu0 %v6294_v19 }
 0x1f6   :  { %5233 = vmatprep.subr.bf16.mxu0 %v6312_v36 }
 0x1f8   :  { %5182 = vmatmul.mubr.bf16.gmra.mrb[20].mxu0 %v5888_v11  ;;  %5150 = vmatmul.mubr.bf16.gmra.mrb[20].mxu1 %v5898_v12  ;;  %v5936_v11 = vld [vmem:[%s7138_s11 + $0x198] sm:$0xff]   ;;  %v5937_v12 = vld [vmem:[%s7138_s11 + $0x1a0] sm:$0xff]  }
 0x1f9   :  { %5234 = vmatpush3.bf16.msra.mxu0 %v6312_v36  ;;  %5185 = vmatprep.mubr.bf16.mxu0 %v5889_v13  ;;  %v5938_v13 = vld [vmem:[%s7138_s11 + $0x1a8] sm:$0xff]  }
 0x1fa   :  { %5235 = vmatprep.subr.bf16.mxu0 %v6308_v35  ;;  %5153 = vmatprep.mubr.bf16.mxu1 %v5901_v14  ;;  %v5939_v14 = vld [vmem:[%s7138_s11 + $0x1b0] sm:$0xff]  }
 0x1fd   :  { %5236 = vmatpush3.bf16.msra.mxu0 %v6308_v35 }
 0x1fe   :  { %5237 = vmatprep.subr.bf16.mxu0 %v6328_v54 }
 0x200   :  { %5186 = vmatmul.mubr.bf16.gmra.mrb[24].mxu0 %v5890_v15  ;;  %5154 = vmatmul.mubr.bf16.gmra.mrb[24].mxu1 %v5902_v16  ;;  %v5940_v15 = vld [vmem:[%s7138_s11 + $0x1b8] sm:$0xff]   ;;  %v5941_v16 = vld [vmem:[%s7138_s11 + $0x1c0] sm:$0xff]  }
 0x201   :  { %5238 = vmatpush3.bf16.msra.mxu0 %v6328_v54  ;;  %5189 = vmatprep.mubr.bf16.mxu0 %v5891_v17  ;;  %v5942_v17 = vld [vmem:[%s7138_s11 + $0x1c8] sm:$0xff]  }
 0x202   :  { %5239 = vmatprep.subr.bf16.mxu0 %v6324_v51  ;;  %5157 = vmatprep.mubr.bf16.mxu1 %v5905_v18  ;;  %v5943_v18 = vld [vmem:[%s7138_s11 + $0x1d0] sm:$0xff]  }
 0x205   :  { %5240 = vmatpush3.bf16.msra.mxu0 %v6324_v51 }
 0x206   :  { %5241 = vmatprep.subr.bf16.mxu0 %v6344_v7 }
 0x208   :  { %5190 = vmatmul.mubr.bf16.gmra.mrb[28].mxu0 %v5892_v21  ;;  %5158 = vmatmul.mubr.bf16.gmra.mrb[28].mxu1 %v5906_v22  ;;  %v5944_v21 = vld [vmem:[%s7138_s11 + $0x1d8] sm:$0xff]   ;;  %v5945_v22 = vld [vmem:[%s7138_s11 + $0x1e0] sm:$0xff]  }
 0x209   :  { %5242 = vmatpush3.bf16.msra.mxu0 %v6344_v7  ;;  %5245 = vmatprep.mubr.bf16.mxu0 %v5895_v23 }
 0x20a   :  { %5243 = vmatprep.subr.bf16.mxu0 %v6340_v5 }
 0x20d   :  { %5244 = vmatpush3.bf16.msra.mxu0 %v6340_v5 }
 0x20e   :  { %5279 = vmatprep.subr.bf16.mxu0 %v6296_v20 }
 0x210   :  { %5246 = vmatmul.mubr.bf16.vlgmr.msra.gmra.mrb[32].mxu0 %v5896_v25 }
 0x211   :  { %5280 = vmatpush3.bf16.msra.mxu0 %v6296_v20  ;;  %5249 = vmatprep.mubr.bf16.mxu0 %v5899_v27 }
 0x212   :  { %5281 = vmatprep.subr.bf16.mxu0 %v6294_v19 }
 0x215   :  { %5282 = vmatpush3.bf16.msra.mxu0 %v6294_v19 }
 0x216   :  { %5283 = vmatprep.subr.bf16.mxu0 %v6312_v36 }
 0x218   :  { %5250 = vmatmul.mubr.bf16.gmra.mrb[36].mxu0 %v5900_v28 }
 0x219   :  { %5284 = vmatpush3.bf16.msra.mxu0 %v6312_v36  ;;  %5253 = vmatprep.mubr.bf16.mxu0 %v5903_v29 }
 0x21a   :  { %5285 = vmatprep.subr.bf16.mxu0 %v6308_v35 }
 0x21d   :  { %5286 = vmatpush3.bf16.msra.mxu0 %v6308_v35 }
 0x21e   :  { %5287 = vmatprep.subr.bf16.mxu0 %v6328_v54 }
 0x220   :  { %5254 = vmatmul.mubr.bf16.gmra.mrb[40].mxu0 %v5904_v30 }
 0x221   :  { %5288 = vmatpush3.bf16.msra.mxu0 %v6328_v54  ;;  %5257 = vmatprep.mubr.bf16.mxu0 %v5907_v31 }
 0x222   :  { %5289 = vmatprep.subr.bf16.mxu0 %v6324_v51 }
 0x225   :  { %5290 = vmatpush3.bf16.msra.mxu0 %v6324_v51 }
 0x226   :  { %5291 = vmatprep.subr.bf16.mxu0 %v6344_v7 }
 0x228   :  { %5258 = vmatmul.mubr.bf16.gmra.mrb[44].mxu0 %v5908_v32 }
 0x229   :  { %5292 = vmatpush3.bf16.msra.mxu0 %v6344_v7  ;;  %5295 = vmatprep.mubr.bf16.mxu0 %v5909_v33 }
 0x22a   :  { %5293 = vmatprep.subr.bf16.mxu0 %v6340_v5 }
 0x22d   :  { %5294 = vmatpush3.bf16.msra.mxu0 %v6340_v5 }
 0x22e   :  { %5329 = vmatprep.subr.bf16.mxu0 %v6296_v20 }
 0x230   :  { %5296 = vmatmul.mubr.bf16.vlgmr.msra.gmra.mrb[48].mxu0 %v5910_v40  ;;  %v6683_v40 = vld [vmem:[%s7132_s5 + $0x8] sm:$0xf] }
 0x231   :  { %5330 = vmatpush3.bf16.msra.mxu0 %v6296_v20  ;;  %5299 = vmatprep.mubr.bf16.mxu0 %v5911_v41 }
 0x232   :  { %5331 = vmatprep.subr.bf16.mxu0 %v6294_v19 }
 0x235   :  { %5332 = vmatpush3.bf16.msra.mxu0 %v6294_v19 }
 0x236   :  { %5333 = vmatprep.subr.bf16.mxu0 %v6312_v36 }
 0x238   :  { %5300 = vmatmul.mubr.bf16.gmra.mrb[52].mxu0 %v5912_v42 }
 0x239   :  { %5334 = vmatpush3.bf16.msra.mxu0 %v6312_v36  ;;  %5303 = vmatprep.mubr.bf16.mxu0 %v5913_v43 }
 0x23a   :  { %5335 = vmatprep.subr.bf16.mxu0 %v6308_v35 }
 0x23d   :  { %5336 = vmatpush3.bf16.msra.mxu0 %v6308_v35 }
 0x23e   :  { %5337 = vmatprep.subr.bf16.mxu0 %v6328_v54 }
 0x240   :  { %5304 = vmatmul.mubr.bf16.gmra.mrb[56].mxu0 %v5914_v44 }
 0x241   :  { %5338 = vmatpush3.bf16.msra.mxu0 %v6328_v54  ;;  %5307 = vmatprep.mubr.bf16.mxu0 %v5915_v45 }
 0x242   :  { %5339 = vmatprep.subr.bf16.mxu0 %v6324_v51 }
 0x245   :  { %5340 = vmatpush3.bf16.msra.mxu0 %v6324_v51 }
 0x246   :  { %5341 = vmatprep.subr.bf16.mxu0 %v6344_v7 }
 0x248   :  { %5308 = vmatmul.mubr.bf16.gmra.mrb[60].mxu0 %v5916_v46 }
 0x249   :  { %5342 = vmatpush3.bf16.msra.mxu0 %v6344_v7  ;;  %5345 = vmatprep.mubr.bf16.mxu0 %v5917_v47  ;;  %v5951_v47 = vld [vmem:[%s7138_s11 + $0x210] sm:$0xff]  }
 0x24a   :  { %5343 = vmatprep.subr.bf16.mxu0 %v6340_v5 }
 0x24d   :  { %5344 = vmatpush3.bf16.msra.mxu0 %v6340_v5 }
 0x24e   :  { %5379 = vmatprep.subr.bf16.mxu0 %v6296_v20 }
 0x250   :  { %5346 = vmatmul.mubr.bf16.vlgmr.msra.gmra.mrb[64].mxu0 %v5918_v49 }
 0x251   :  { %5380 = vmatpush3.bf16.msra.mxu0 %v6296_v20  ;;  %5349 = vmatprep.mubr.bf16.mxu0 %v5919_v50 }
 0x252   :  { %5381 = vmatprep.subr.bf16.mxu0 %v6294_v19 }
 0x255   :  { %5382 = vmatpush3.bf16.msra.mxu0 %v6294_v19 }
 0x256   :  { %5383 = vmatprep.subr.bf16.mxu0 %v6312_v36 }
 0x258   :  { %5350 = vmatmul.mubr.bf16.gmra.mrb[68].mxu0 %v5920_v55 }
 0x259   :  { %5384 = vmatpush3.bf16.msra.mxu0 %v6312_v36  ;;  %5353 = vmatprep.mubr.bf16.mxu0 %v5921_v56 }
 0x25a   :  { %5385 = vmatprep.subr.bf16.mxu0 %v6308_v35 }
 0x25d   :  { %5386 = vmatpush3.bf16.msra.mxu0 %v6308_v35 }
 0x25e   :  { %5387 = vmatprep.subr.bf16.mxu0 %v6328_v54 }
 0x260   :  { %5354 = vmatmul.mubr.bf16.gmra.mrb[72].mxu0 %v5922_v57 }
 0x261   :  { %5388 = vmatpush3.bf16.msra.mxu0 %v6328_v54  ;;  %5357 = vmatprep.mubr.bf16.mxu0 %v5923_v58 }
 0x262   :  { %5389 = vmatprep.subr.bf16.mxu0 %v6324_v51 }
 0x265   :  { %5390 = vmatpush3.bf16.msra.mxu0 %v6324_v51 }
 0x266   :  { %5391 = vmatprep.subr.bf16.mxu0 %v6344_v7 }
 0x268   :  { %5358 = vmatmul.mubr.bf16.gmra.mrb[76].mxu0 %v5924_v59 }
 0x269   :  { %5392 = vmatpush3.bf16.msra.mxu0 %v6344_v7  ;;  %5395 = vmatprep.mubr.bf16.mxu0 %v5925_v60 }
 0x26a   :  { %5393 = vmatprep.subr.bf16.mxu0 %v6340_v5 }
 0x26d   :  { %5394 = vmatpush3.bf16.msra.mxu0 %v6340_v5 }
 0x26e   :  { %5429 = vmatprep.subr.bf16.mxu0 %v6296_v20 }
 0x270   :  { %5396 = vmatmul.mubr.bf16.vlgmr.msra.gmra.mrb[80].mxu0 %v5926_v61  ;;  %v5952_v61 = vld [vmem:[%s7138_s11 + $0x218] sm:$0xff]  }
 0x271   :  { %5430 = vmatpush3.bf16.msra.mxu0 %v6296_v20  ;;  %5399 = vmatprep.mubr.bf16.mxu0 %v5927_v62 }
 0x272   :  { %5431 = vmatprep.subr.bf16.mxu0 %v6294_v19 }
 0x275   :  { %5432 = vmatpush3.bf16.msra.mxu0 %v6294_v19 }
 0x276   :  { %5433 = vmatprep.subr.bf16.mxu0 %v6312_v36 }
 0x278   :  { %5400 = vmatmul.mubr.bf16.gmra.mrb[84].mxu0 %v5928_v63 }
 0x279   :  { %5434 = vmatpush3.bf16.msra.mxu0 %v6312_v36  ;;  %5403 = vmatprep.mubr.bf16.mxu0 %v5929_v0  ;;  %v5953_v0 = vld [vmem:[%s7138_s11 + $0x220] sm:$0xff]  }
 0x27a   :  { %5435 = vmatprep.subr.bf16.mxu0 %v6308_v35 }
 0x27d   :  { %5436 = vmatpush3.bf16.msra.mxu0 %v6308_v35 }
 0x27e   :  { %5437 = vmatprep.subr.bf16.mxu0 %v6328_v54 }
 0x280   :  { %5404 = vmatmul.mubr.bf16.gmra.mrb[88].mxu0 %v5930_v1 }
 0x281   :  { %5438 = vmatpush3.bf16.msra.mxu0 %v6328_v54  ;;  %5407 = vmatprep.mubr.bf16.mxu0 %v5931_v4 }
 0x282   :  { %5439 = vmatprep.subr.bf16.mxu0 %v6324_v51 }
 0x285   :  { %5440 = vmatpush3.bf16.msra.mxu0 %v6324_v51 }
 0x286   :  { %5441 = vmatprep.subr.bf16.mxu0 %v6344_v7 }
 0x288   :  { %5408 = vmatmul.mubr.bf16.gmra.mrb[92].mxu0 %v5932_v6 }
 0x289   :  { %5442 = vmatpush3.bf16.msra.mxu0 %v6344_v7  ;;  %5445 = vmatprep.mubr.bf16.mxu0 %v5933_v8 }
 0x28a   :  { %5443 = vmatprep.subr.bf16.mxu0 %v6340_v5 }
 0x28d   :  { %5444 = vmatpush3.bf16.msra.mxu0 %v6340_v5 }
 0x28e   :  { %5479 = vmatprep.subr.bf16.mxu0 %v6296_v20 }
 0x290   :  { %5446 = vmatmul.mubr.bf16.vlgmr.msra.gmra.mrb[96].mxu0 %v5934_v9 }
 0x291   :  { %5480 = vmatpush3.bf16.msra.mxu0 %v6296_v20  ;;  %5449 = vmatprep.mubr.bf16.mxu0 %v5935_v10 }
 0x292   :  { %5481 = vmatprep.subr.bf16.mxu0 %v6294_v19 }
 0x295   :  { %5482 = vmatpush3.bf16.msra.mxu0 %v6294_v19 }
 0x296   :  { %5483 = vmatprep.subr.bf16.mxu0 %v6312_v36 }
 0x298   :  { %5450 = vmatmul.mubr.bf16.gmra.mrb[100].mxu0 %v5936_v11 }
 0x299   :  { %5484 = vmatpush3.bf16.msra.mxu0 %v6312_v36  ;;  %5453 = vmatprep.mubr.bf16.mxu0 %v5937_v12 }
 0x29a   :  { %5485 = vmatprep.subr.bf16.mxu0 %v6308_v35 }
 0x29d   :  { %5486 = vmatpush3.bf16.msra.mxu0 %v6308_v35 }
 0x29e   :  { %5487 = vmatprep.subr.bf16.mxu0 %v6328_v54 }
 0x2a0   :  { %5454 = vmatmul.mubr.bf16.gmra.mrb[104].mxu0 %v5938_v13 }
 0x2a1   :  { %5488 = vmatpush3.bf16.msra.mxu0 %v6328_v54  ;;  %5457 = vmatprep.mubr.bf16.mxu0 %v5939_v14 }
 0x2a2   :  { %5489 = vmatprep.subr.bf16.mxu0 %v6324_v51 }
 0x2a5   :  { %5490 = vmatpush3.bf16.msra.mxu0 %v6324_v51 }
 0x2a6   :  { %5491 = vmatprep.subr.bf16.mxu0 %v6344_v7 }
 0x2a8   :  { %5458 = vmatmul.mubr.bf16.gmra.mrb[108].mxu0 %v5940_v15  ;;  %v5954_v15 = vld [vmem:[%s7138_s11 + $0x228] sm:$0xff]  }
 0x2a9   :  { %5492 = vmatpush3.bf16.msra.mxu0 %v6344_v7  ;;  %5495 = vmatprep.mubr.bf16.mxu0 %v5941_v16 }
 0x2aa   :  { %5493 = vmatprep.subr.bf16.mxu0 %v6340_v5 }
 0x2ad   :  { %5494 = vmatpush3.bf16.msra.mxu0 %v6340_v5 }
 0x2ae   :  { %5529 = vmatprep.subr.bf16.mxu0 %v6296_v20 }
 0x2b0   :  { %5496 = vmatmul.mubr.bf16.vlgmr.msra.gmra.mrb[112].mxu0 %v5942_v17 }
 0x2b1   :  { %5530 = vmatpush3.bf16.msra.mxu0 %v6296_v20  ;;  %5499 = vmatprep.mubr.bf16.mxu0 %v5943_v18  ;;  %v5946_v20 = vld [vmem:[%s7138_s11 + $0x1e8] sm:$0xff]   ;;  %v5955_v18 = vld [vmem:[%s7138_s11 + $0x230] sm:$0xff]  }
 0x2b2   :  { %5531 = vmatprep.subr.bf16.mxu0 %v6294_v19 }
 0x2b5   :  { %5532 = vmatpush3.bf16.msra.mxu0 %v6294_v19  ;;  %v5947_v19 = vld [vmem:[%s7138_s11 + $0x1f0] sm:$0xff]  }
 0x2b6   :  { %5533 = vmatprep.subr.bf16.mxu0 %v6312_v36 }
 0x2b8   :  { %5500 = vmatmul.mubr.bf16.gmra.mrb[116].mxu0 %v5944_v21 }
 0x2b9   :  { %5534 = vmatpush3.bf16.msra.mxu0 %v6312_v36  ;;  %5503 = vmatprep.mubr.bf16.mxu0 %v5945_v22 }
 0x2ba   :  { %5535 = vmatprep.subr.bf16.mxu0 %v6308_v35 }
 0x2bd   :  { %5536 = vmatpush3.bf16.msra.mxu0 %v6308_v35  ;;  %v5948_v35 = vld [vmem:[%s7138_s11 + $0x1f8] sm:$0xff]  }
 0x2be   :  { %5537 = vmatprep.subr.bf16.mxu0 %v6328_v54 }
 0x2c0   :  { %5504 = vmatmul.mubr.bf16.gmra.mrb[120].mxu0 %v5946_v20 }
 0x2c1   :  { %5538 = vmatpush3.bf16.msra.mxu0 %v6328_v54  ;;  %5507 = vmatprep.mubr.bf16.mxu0 %v5947_v19 }
 0x2c2   :  { %5539 = vmatprep.subr.bf16.mxu0 %v6324_v51 }
 0x2c3   :  { %v5179_v36 = vpop.f32.mrb[16].mxu0  ;;  %v6656_v23 = vpop.f32.mrb[16].mxu1 }
 0x2c4   :  { %v722_v25 = vpop.f32.mrb[17].mxu0  ;;  %v6658_v27 = vpop.f32.mrb[17].mxu1 }
 0x2c5   :  { %v5180_v28 = vpop.f32.mrb[18].mxu0  ;;  %5540 = vmatpush3.bf16.msra.mxu0 %v6324_v51  ;;  %v6664_v29 = vpop.f32.mrb[18].mxu1  ;;  %v5949_v51 = vld [vmem:[%s7138_s11 + $0x200] sm:$0xff]  }
 0x2c6   :  { %v786_v30 = vpack.c.bf16 %v5180_v28, %v5179_v36  ;;  %v725_v54 = vpop.f32.mrb[19].mxu0  ;;  %5541 = vmatprep.subr.bf16.mxu0 %v6344_v7  ;;  %v615_v31 = vpack.c.bf16 %v6664_v29, %v6656_v23  ;;  %v6669_v32 = vpop.f32.mrb[19].mxu1 }
 0x2c7   :  { %v785_v33 = vpack.c.bf16 %v725_v54, %v722_v25  ;;  %v614_v34 = vpack.c.bf16 %v6669_v32, %v6658_v27  ;;  %v1525_v27 = vld [vmem:[%s7132_s5 + $0xc] sm:$0xf] }
 0x2c8   :  { %5508 = vmatmul.mubr.bf16.gmra.mrb[124].mxu0 %v5948_v35 }
 0x2c9   :  { %5195 = vmatprep.mubr.msk.bf16.mxu1 %vm794_vm3, %v785_v33  ;;  %5542 = vmatpush3.bf16.msra.mxu0 %v6344_v7  ;;  %v5950_v7 = vld [vmem:[%s7138_s11 + $0x208] sm:$0xff]  }
 0x2ca   :  { %5196 = vmatmul.mubr.msk.bf16.vlgmr.msra.gmra.mrb[32].mxu1 %vm794_vm3, %v786_v30  ;;  %5543 = vmatprep.subr.bf16.mxu0 %v6340_v5  ;;  %v5956_v30 = vld [vmem:[%s7138_s11 + $0x238] sm:$0xff]  }
 0x2cb   :  { %v5183_v41 = vpop.f32.mrb[20].mxu0  ;;  %5212 = vmatpush3.bf16.msra.mxu1 %v945_v37  ;;  %v6687_v42 = vpop.f32.mrb[20].mxu1  ;;  %5545 = vmatprep.mubr.bf16.mxu0 %v5949_v51 }
 0x2cc   :  { %v738_v43 = vpop.f32.mrb[21].mxu0  ;;  %v6689_v44 = vpop.f32.mrb[21].mxu1  ;;  %5860 = vmatprep.subr.msk.bf16.mxu1 %vm819_vm2, %v6683_v40 }
 0x2cd   :  { %v5184_v45 = vpop.f32.mrb[22].mxu0  ;;  %5544 = vmatpush3.bf16.msra.mxu0 %v6340_v5  ;;  %v6697_v46 = vpop.f32.mrb[22].mxu1 }
 0x2ce   :  { %v788_v48 = vpack.c.bf16 %v5184_v45, %v5183_v41  ;;  %v741_v49 = vpop.f32.mrb[23].mxu0  ;;  %v617_v50 = vpack.c.bf16 %v6697_v46, %v6687_v42  ;;  %v570_v55 = vpop.f32.mrb[23].mxu1  ;;  %v1240_v41 = vsel %vm819_vm2, %v6683_v40, 0 }
 0x2cf   :  { %v787_v56 = vpack.c.bf16 %v741_v49, %v738_v43  ;;  %v616_v57 = vpack.c.bf16 %v570_v55, %v6689_v44 }
 0x2d0   :  { %5546 = vmatmul.mubr.bf16.vlgmr.msra.gmra.mrb[128].mxu0 %v5950_v7 }
 0x2d1   :  { %5199 = vmatprep.mubr.msk.bf16.mxu1 %vm794_vm3, %v787_v56  ;;  %5549 = vmatprep.mubr.bf16.mxu0 %v5951_v47 }
 0x2d2   :  { %5200 = vmatmul.mubr.msk.bf16.gmra.mrb[36].mxu1 %vm794_vm3, %v788_v48 }
 0x2d3   :  { %v5187_v5 = vpop.f32.mrb[24].mxu0  ;;  %v6707_v58 = vpop.f32.mrb[24].mxu1 }
 0x2d4   :  { %v754_v59 = vpop.f32.mrb[25].mxu0  ;;  %v583_v60 = vpop.f32.mrb[25].mxu1 }
 0x2d5   :  { %v5188_v62 = vpop.f32.mrb[26].mxu0  ;;  %v5156_v63 = vpop.f32.mrb[26].mxu1 }
 0x2d6   :  { %v790_v1 = vpack.c.bf16 %v5188_v62, %v5187_v5  ;;  %v757_v4 = vpop.f32.mrb[27].mxu0  ;;  %v619_v6 = vpack.c.bf16 %v5156_v63, %v6707_v58  ;;  %v586_v8 = vpop.f32.mrb[27].mxu1  ;;  %v1551_v62 = vsel %vm819_vm2, %v1525_v27, 0  ;;  %v1836_v63 = vld [vmem:[%s7132_s5 + $0x10] sm:$0xf] }
 0x2d7   :  { %v789_v9 = vpack.c.bf16 %v757_v4, %v754_v59  ;;  %v618_v10 = vpack.c.bf16 %v586_v8, %v583_v60 }
 0x2d8   :  { %5550 = vmatmul.mubr.bf16.gmra.mrb[132].mxu0 %v5952_v61 }
 0x2d9   :  { %5203 = vmatprep.mubr.msk.bf16.mxu1 %vm794_vm3, %v789_v9  ;;  %5553 = vmatprep.mubr.bf16.mxu0 %v5953_v0 }
 0x2da   :  { %5204 = vmatmul.mubr.msk.bf16.gmra.mrb[40].mxu1 %vm794_vm3, %v790_v1 }
 0x2db   :  { %v5191_v11 = vpop.f32.mrb[28].mxu0  ;;  %v5159_v12 = vpop.f32.mrb[28].mxu1 }
 0x2dc   :  { %v770_v13 = vpop.f32.mrb[29].mxu0  ;;  %v599_v14 = vpop.f32.mrb[29].mxu1 }
 0x2dd   :  { %v5192_v16 = vpop.f32.mrb[30].mxu0  ;;  %v5160_v17 = vpop.f32.mrb[30].mxu1 }
 0x2de   :  { %v792_v21 = vpack.c.bf16 %v5192_v16, %v5191_v11  ;;  %v773_v22 = vpop.f32.mrb[31].mxu0  ;;  %v621_v20 = vpack.c.bf16 %v5160_v17, %v5159_v12  ;;  %v602_v19 = vpop.f32.mrb[31].mxu1 }
 0x2df   :  { %v791_v36 = vpack.c.bf16 %v773_v22, %v770_v13  ;;  %v620_v25 = vpack.c.bf16 %v602_v19, %v599_v14 }
 0x2e0   :  { %5554 = vmatmul.mubr.bf16.gmra.mrb[136].mxu0 %v5954_v15 }
 0x2e1   :  { %5207 = vmatprep.mubr.msk.bf16.mxu1 %vm794_vm3, %v791_v36  ;;  %5557 = vmatprep.mubr.bf16.mxu0 %v5955_v18 }
 0x2e2   :  { %5208 = vmatmul.mubr.msk.bf16.gmra.mrb[44].mxu1 %vm794_vm3, %v792_v21 }
 0x2e3   :  { %5213 = vmatprep.mubr.msk.bf16.mxu1 %vm794_vm3, %v614_v34  ;;  %v5247_v35 = vpop.f32.mrb[32].mxu0 }
 0x2e4   :  { %v1143_v28 = vpop.f32.mrb[33].mxu0 }
 0x2e5   :  { %v5248_v54 = vpop.f32.mrb[34].mxu0 }
 0x2e6   :  { %v1207_v33 = vpack.c.bf16 %v5248_v54, %v5247_v35  ;;  %v1146_v51 = vpop.f32.mrb[35].mxu0  ;;  %v1862_v54 = vsel %vm819_vm2, %v1836_v63, 0 }
 0x2e7   :  { %v1206_v37 = vpack.c.bf16 %v1146_v51, %v1143_v28 }
 0x2e8   :  { %5558 = vmatmul.mubr.bf16.gmra.mrb[140].mxu0 %v5956_v30 }
 0x2ea   :  { %5214 = vmatmul.mubr.msk.bf16.vlgmr.msra.gmra.mrb[32].mxu1 %vm794_vm3, %v615_v31 }
 0x2eb   :  { %5262 = vmatpush3.bf16.msra.mxu1 %v1240_v41  ;;  %5217 = vmatprep.mubr.msk.bf16.mxu1 %vm794_vm3, %v616_v57  ;;  %v5251_v32 = vpop.f32.mrb[36].mxu0 }
 0x2ec   :  { %v1159_v34 = vpop.f32.mrb[37].mxu0  ;;  %5861 = vmatprep.subr.msk.bf16.mxu1 %vm819_vm2, %v1525_v27 }
 0x2ed   :  { %v5252_v43 = vpop.f32.mrb[38].mxu0 }
 0x2ee   :  { %v1209_v44 = vpack.c.bf16 %v5252_v43, %v5251_v32  ;;  %v1162_v40 = vpop.f32.mrb[39].mxu0 }
 0x2ef   :  { %v1208_v7 = vpack.c.bf16 %v1162_v40, %v1159_v34 }
 0x2f2   :  { %5218 = vmatmul.mubr.msk.bf16.gmra.mrb[36].mxu1 %vm794_vm3, %v617_v50 }
 0x2f3   :  { %5221 = vmatprep.mubr.msk.bf16.mxu1 %vm794_vm3, %v618_v10  ;;  %v5255_v23 = vpop.f32.mrb[40].mxu0 }
 0x2f4   :  { %v1175_v29 = vpop.f32.mrb[41].mxu0 }
 0x2f5   :  { %v5256_v31 = vpop.f32.mrb[42].mxu0 }
 0x2f6   :  { %v1211_v45 = vpack.c.bf16 %v5256_v31, %v5255_v23  ;;  %v1178_v47 = vpop.f32.mrb[43].mxu0 }
 0x2f7   :  { %v1210_v48 = vpack.c.bf16 %v1178_v47, %v1175_v29 }
 0x2fa   :  { %5222 = vmatmul.mubr.msk.bf16.gmra.mrb[40].mxu1 %vm794_vm3, %v619_v6 }
 0x2fb   :  { %5225 = vmatprep.mubr.msk.bf16.mxu1 %vm794_vm3, %v620_v25  ;;  %v5259_v49 = vpop.f32.mrb[44].mxu0 }
 0x2fc   :  { %v1191_v55 = vpop.f32.mrb[45].mxu0 }
 0x2fd   :  { %v5260_v56 = vpop.f32.mrb[46].mxu0 }
 0x2fe   :  { %v1213_v57 = vpack.c.bf16 %v5260_v56, %v5259_v49  ;;  %v1194_v5 = vpop.f32.mrb[47].mxu0 }
 0x2ff   :  { %v1212_v42 = vpack.c.bf16 %v1194_v5, %v1191_v55 }
 0x302   :  { %5226 = vmatmul.mubr.msk.bf16.gmra.mrb[44].mxu1 %vm794_vm3, %v621_v20 }
 0x303   :  { %5263 = vmatprep.mubr.msk.bf16.mxu1 %vm794_vm3, %v1206_v37  ;;  %v5297_v46 = vpop.f32.mrb[48].mxu0 }
 0x304   :  { %v1454_v50 = vpop.f32.mrb[49].mxu0 }
 0x305   :  { %v5298_v58 = vpop.f32.mrb[50].mxu0 }
 0x306   :  { %v1518_v59 = vpack.c.bf16 %v5298_v58, %v5297_v46  ;;  %v1457_v60 = vpop.f32.mrb[51].mxu0 }
 0x307   :  { %v1517_v61 = vpack.c.bf16 %v1457_v60, %v1454_v50 }
 0x30a   :  { %5264 = vmatmul.mubr.msk.bf16.vlgmr.msra.gmra.mrb[32].mxu1 %vm794_vm3, %v1207_v33  ;;  %v2147_v33 = vld [vmem:[%s7132_s5 + $0x14] sm:$0xf] }
 0x30b   :  { %5312 = vmatpush3.bf16.msra.mxu1 %v1551_v62  ;;  %5267 = vmatprep.mubr.msk.bf16.mxu1 %vm794_vm3, %v1208_v7  ;;  %v5301_v0 = vpop.f32.mrb[52].mxu0  ;;  %v2173_v58 = vsel %vm819_vm2, %v2147_v33, 0 }
 0x30c   :  { %v1470_v1 = vpop.f32.mrb[53].mxu0  ;;  %5862 = vmatprep.subr.msk.bf16.mxu1 %vm819_vm2, %v1836_v63 }
 0x30d   :  { %v5302_v4 = vpop.f32.mrb[54].mxu0 }
 0x30e   :  { %v1520_v6 = vpack.c.bf16 %v5302_v4, %v5301_v0  ;;  %v1473_v8 = vpop.f32.mrb[55].mxu0 }
 0x30f   :  { %v1519_v9 = vpack.c.bf16 %v1473_v8, %v1470_v1 }
 0x312   :  { %5268 = vmatmul.mubr.msk.bf16.gmra.mrb[36].mxu1 %vm794_vm3, %v1209_v44 }
 0x313   :  { %5271 = vmatprep.mubr.msk.bf16.mxu1 %vm794_vm3, %v1210_v48  ;;  %v5305_v10 = vpop.f32.mrb[56].mxu0 }
 0x314   :  { %v1486_v11 = vpop.f32.mrb[57].mxu0 }
 0x315   :  { %v5306_v12 = vpop.f32.mrb[58].mxu0 }
 0x316   :  { %v1522_v13 = vpack.c.bf16 %v5306_v12, %v5305_v10  ;;  %v1489_v14 = vpop.f32.mrb[59].mxu0 }
 0x317   :  { %v1521_v15 = vpack.c.bf16 %v1489_v14, %v1486_v11 }
 0x31a   :  { %5272 = vmatmul.mubr.msk.bf16.gmra.mrb[40].mxu1 %vm794_vm3, %v1211_v45 }
 0x31b   :  { %5275 = vmatprep.mubr.msk.bf16.mxu1 %vm794_vm3, %v1212_v42  ;;  %v5309_v16 = vpop.f32.mrb[60].mxu0 }
 0x31c   :  { %v1502_v17 = vpop.f32.mrb[61].mxu0 }
 0x31d   :  { %v5310_v18 = vpop.f32.mrb[62].mxu0 }
 0x31e   :  { %v1524_v21 = vpack.c.bf16 %v5310_v18, %v5309_v16  ;;  %v1505_v22 = vpop.f32.mrb[63].mxu0  ;;  %v3268_v18 = vld [vmem:[%s7134_s7] sm:$0xf]  ;;  %s4353_s7 = sshll.u32 %s6096_s30, 4  ;;  %s4354_s7 = int_to_ptr.vmem [resolvable:$true] %s4353_s7 }
 0x31f   :  { %v1523_v20 = vpack.c.bf16 %v1505_v22, %v1502_v17  ;;  %5867 = vmatprep.subr.msk.bf16.mxu0 %vm819_vm2, %v3268_v18  ;;  %v3301_v22 = vsel %vm819_vm2, %v3268_v18, 0  ;;  %p6049_p1 = scmp.lt.s32.totalorder %s4354_s7, %s4354_s7 }
 0x320   :  { %5580 = vmatpush3.bf16.msra.mxu0 %v3301_v22 }
 0x322   :  { %5276 = vmatmul.mubr.msk.bf16.gmra.mrb[44].mxu1 %vm794_vm3, %v1213_v57 }
 0x323   :  { %5313 = vmatprep.mubr.msk.bf16.mxu1 %vm794_vm3, %v1517_v61  ;;  %v5347_v19 = vpop.f32.mrb[64].mxu0 }
 0x324   :  { %v1765_v36 = vpop.f32.mrb[65].mxu0 }
 0x325   :  { %v5348_v25 = vpop.f32.mrb[66].mxu0 }
 0x326   :  { %v1829_v35 = vpack.c.bf16 %v5348_v25, %v5347_v19  ;;  %v1768_v28 = vpop.f32.mrb[67].mxu0 }
 0x327   :  { %v1828_v30 = vpack.c.bf16 %v1768_v28, %v1765_v36 }
 0x32a   :  { %5314 = vmatmul.mubr.msk.bf16.vlgmr.msra.gmra.mrb[32].mxu1 %vm794_vm3, %v1518_v59  ;;  %v2458_v59 = vld [vmem:[%s7132_s5 + $0x18] sm:$0xf] }
 0x32b   :  { %5362 = vmatpush3.bf16.msra.mxu1 %v1862_v54  ;;  %5317 = vmatprep.mubr.msk.bf16.mxu1 %vm794_vm3, %v1519_v9  ;;  %v5351_v51 = vpop.f32.mrb[68].mxu0  ;;  %v2484_v28 = vsel %vm819_vm2, %v2458_v59, 0 }
 0x32c   :  { %v1781_v37 = vpop.f32.mrb[69].mxu0  ;;  %5863 = vmatprep.subr.msk.bf16.mxu1 %vm819_vm2, %v2147_v33 }
 0x32d   :  { %v5352_v41 = vpop.f32.mrb[70].mxu0 }
 0x32e   :  { %v1831_v27 = vpack.c.bf16 %v5352_v41, %v5351_v51  ;;  %v1784_v32 = vpop.f32.mrb[71].mxu0 }
 0x32f   :  { %v1830_v34 = vpack.c.bf16 %v1784_v32, %v1781_v37 }
 0x332   :  { %5318 = vmatmul.mubr.msk.bf16.gmra.mrb[36].mxu1 %vm794_vm3, %v1520_v6 }
 0x333   :  { %5321 = vmatprep.mubr.msk.bf16.mxu1 %vm794_vm3, %v1521_v15  ;;  %v5355_v43 = vpop.f32.mrb[72].mxu0 }
 0x334   :  { %v1797_v44 = vpop.f32.mrb[73].mxu0 }
 0x335   :  { %v5356_v40 = vpop.f32.mrb[74].mxu0 }
 0x336   :  { %v1833_v7 = vpack.c.bf16 %v5356_v40, %v5355_v43  ;;  %v1800_v23 = vpop.f32.mrb[75].mxu0 }
 0x337   :  { %v1832_v29 = vpack.c.bf16 %v1800_v23, %v1797_v44 }
 0x33a   :  { %5322 = vmatmul.mubr.msk.bf16.gmra.mrb[40].mxu1 %vm794_vm3, %v1522_v13 }
 0x33b   :  { %5325 = vmatprep.mubr.msk.bf16.mxu1 %vm794_vm3, %v1523_v20  ;;  %v5359_v31 = vpop.f32.mrb[76].mxu0 }
 0x33c   :  { %v1813_v45 = vpop.f32.mrb[77].mxu0 }
 0x33d   :  { %v5360_v47 = vpop.f32.mrb[78].mxu0 }
 0x33e   :  { %v1835_v48 = vpack.c.bf16 %v5360_v47, %v5359_v31  ;;  %v1816_v49 = vpop.f32.mrb[79].mxu0 }
 0x33f   :  { %v1834_v55 = vpack.c.bf16 %v1816_v49, %v1813_v45 }
 0x342   :  { %5326 = vmatmul.mubr.msk.bf16.gmra.mrb[44].mxu1 %vm794_vm3, %v1524_v21 }
 0x343   :  { %5363 = vmatprep.mubr.msk.bf16.mxu1 %vm794_vm3, %v1828_v30  ;;  %v5397_v56 = vpop.f32.mrb[80].mxu0  ;;  %v2769_v30 = vld [vmem:[%s7132_s5 + $0x1c] sm:$0xf] }
 0x344   :  { %v2076_v57 = vpop.f32.mrb[81].mxu0 }
 0x345   :  { %v5398_v5 = vpop.f32.mrb[82].mxu0 }
 0x346   :  { %v2140_v42 = vpack.c.bf16 %v5398_v5, %v5397_v56  ;;  %v2079_v46 = vpop.f32.mrb[83].mxu0 }
 0x347   :  { %v2139_v50 = vpack.c.bf16 %v2079_v46, %v2076_v57  ;;  %v2795_v46 = vsel %vm819_vm2, %v2769_v30, 0 }
 0x34a   :  { %5364 = vmatmul.mubr.msk.bf16.vlgmr.msra.gmra.mrb[32].mxu1 %vm794_vm3, %v1829_v35 }
 0x34b   :  { %5412 = vmatpush3.bf16.msra.mxu1 %v2173_v58  ;;  %5367 = vmatprep.mubr.msk.bf16.mxu1 %vm794_vm3, %v1830_v34  ;;  %v5401_v60 = vpop.f32.mrb[84].mxu0 }
 0x34c   :  { %v2092_v61 = vpop.f32.mrb[85].mxu0  ;;  %5864 = vmatprep.subr.msk.bf16.mxu1 %vm819_vm2, %v2458_v59 }
 0x34d   :  { %v5402_v62 = vpop.f32.mrb[86].mxu0 }
 0x34e   :  { %v2142_v63 = vpack.c.bf16 %v5402_v62, %v5401_v60  ;;  %v2095_v0 = vpop.f32.mrb[87].mxu0 }
 0x34f   :  { %v2141_v1 = vpack.c.bf16 %v2095_v0, %v2092_v61 }
 0x352   :  { %5368 = vmatmul.mubr.msk.bf16.gmra.mrb[36].mxu1 %vm794_vm3, %v1831_v27 }
 0x353   :  { %5371 = vmatprep.mubr.msk.bf16.mxu1 %vm794_vm3, %v1832_v29  ;;  %v5405_v4 = vpop.f32.mrb[88].mxu0 }
 0x354   :  { %v2108_v6 = vpop.f32.mrb[89].mxu0 }
 0x355   :  { %v5406_v8 = vpop.f32.mrb[90].mxu0 }
 0x356   :  { %v2144_v9 = vpack.c.bf16 %v5406_v8, %v5405_v4  ;;  %v2111_v10 = vpop.f32.mrb[91].mxu0 }
 0x357   :  { %v2143_v11 = vpack.c.bf16 %v2111_v10, %v2108_v6 }
 0x35a   :  { %5372 = vmatmul.mubr.msk.bf16.gmra.mrb[40].mxu1 %vm794_vm3, %v1833_v7 }
 0x35b   :  { %5375 = vmatprep.mubr.msk.bf16.mxu1 %vm794_vm3, %v1834_v55  ;;  %v5409_v12 = vpop.f32.mrb[92].mxu0 }
 0x35c   :  { %v2124_v13 = vpop.f32.mrb[93].mxu0 }
 0x35d   :  { %v5410_v14 = vpop.f32.mrb[94].mxu0 }
 0x35e   :  { %v2146_v15 = vpack.c.bf16 %v5410_v14, %v5409_v12  ;;  %v2127_v16 = vpop.f32.mrb[95].mxu0 }
 0x35f   :  { %v2145_v17 = vpack.c.bf16 %v2127_v16, %v2124_v13 }
 0x362   :  { %5376 = vmatmul.mubr.msk.bf16.gmra.mrb[44].mxu1 %vm794_vm3, %v1835_v48 }
 0x363   :  { %5413 = vmatprep.mubr.msk.bf16.mxu1 %vm794_vm3, %v2139_v50  ;;  %v5447_v21 = vpop.f32.mrb[96].mxu0  ;;  %v3080_v50 = vld [vmem:[%s7132_s5 + $0x20] sm:$0xf] }
 0x364   :  { %v2387_v20 = vpop.f32.mrb[97].mxu0 }
 0x365   :  { %v5448_v19 = vpop.f32.mrb[98].mxu0 }
 0x366   :  { %v2451_v36 = vpack.c.bf16 %v5448_v19, %v5447_v21  ;;  %v2390_v25 = vpop.f32.mrb[99].mxu0  ;;  %v3106_v19 = vsel %vm819_vm2, %v3080_v50, 0 }
 0x367   :  { %v2450_v35 = vpack.c.bf16 %v2390_v25, %v2387_v20 }
 0x36a   :  { %5414 = vmatmul.mubr.msk.bf16.vlgmr.msra.gmra.mrb[32].mxu1 %vm794_vm3, %v2140_v42 }
 0x36b   :  { %5462 = vmatpush3.bf16.msra.mxu1 %v2484_v28  ;;  %5417 = vmatprep.mubr.msk.bf16.mxu1 %vm794_vm3, %v2141_v1  ;;  %v5451_v54 = vpop.f32.mrb[100].mxu0 }
 0x36c   :  { %v2403_v33 = vpop.f32.mrb[101].mxu0  ;;  %5865 = vmatprep.subr.msk.bf16.mxu1 %vm819_vm2, %v2769_v30 }
 0x36d   :  { %v5452_v51 = vpop.f32.mrb[102].mxu0 }
 0x36e   :  { %v2453_v37 = vpack.c.bf16 %v5452_v51, %v5451_v54  ;;  %v2406_v41 = vpop.f32.mrb[103].mxu0 }
 0x36f   :  { %v2452_v27 = vpack.c.bf16 %v2406_v41, %v2403_v33 }
 0x372   :  { %5418 = vmatmul.mubr.msk.bf16.gmra.mrb[36].mxu1 %vm794_vm3, %v2142_v63 }
 0x373   :  { %5421 = vmatprep.mubr.msk.bf16.mxu1 %vm794_vm3, %v2143_v11  ;;  %v5455_v32 = vpop.f32.mrb[104].mxu0 }
 0x374   :  { %v2419_v34 = vpop.f32.mrb[105].mxu0 }
 0x375   :  { %v5456_v43 = vpop.f32.mrb[106].mxu0 }
 0x376   :  { %v2455_v44 = vpack.c.bf16 %v5456_v43, %v5455_v32  ;;  %v2422_v40 = vpop.f32.mrb[107].mxu0 }
 0x377   :  { %v2454_v7 = vpack.c.bf16 %v2422_v40, %v2419_v34 }
 0x37a   :  { %5422 = vmatmul.mubr.msk.bf16.gmra.mrb[40].mxu1 %vm794_vm3, %v2144_v9 }
 0x37b   :  { %5425 = vmatprep.mubr.msk.bf16.mxu1 %vm794_vm3, %v2145_v17  ;;  %v5459_v23 = vpop.f32.mrb[108].mxu0 }
 0x37c   :  { %v2435_v29 = vpop.f32.mrb[109].mxu0 }
 0x37d   :  { %v5460_v31 = vpop.f32.mrb[110].mxu0 }
 0x37e   :  { %v2457_v45 = vpack.c.bf16 %v5460_v31, %v5459_v23  ;;  %v2438_v47 = vpop.f32.mrb[111].mxu0  ;;  %v4676_v31 = vld [vmem:[%s7133_s6] ss:$0 sm:$0xff] }
 0x37f   :  { %v2456_v48 = vpack.c.bf16 %v2438_v47, %v2435_v29  ;;  %v5957_v29 = vld [vmem:[%s7136_s9] sm:$0xff]  }
 0x380   :  { %5597 = vmatprep.subr.bf16.mxu0 %v5957_v29 }
 0x382   :  { %5426 = vmatmul.mubr.msk.bf16.gmra.mrb[44].mxu1 %vm794_vm3, %v2146_v15 }
 0x383   :  { %5463 = vmatprep.mubr.msk.bf16.mxu1 %vm794_vm3, %v2450_v35  ;;  %v5497_v49 = vpop.f32.mrb[112].mxu0 }
 0x384   :  { %v2698_v55 = vpop.f32.mrb[113].mxu0 }
 0x385   :  { %v5498_v56 = vpop.f32.mrb[114].mxu0 }
 0x386   :  { %v2762_v57 = vpack.c.bf16 %v5498_v56, %v5497_v49  ;;  %v2701_v5 = vpop.f32.mrb[115].mxu0 }
 0x387   :  { %v2761_v42 = vpack.c.bf16 %v2701_v5, %v2698_v55 }
 0x38a   :  { %5464 = vmatmul.mubr.msk.bf16.vlgmr.msra.gmra.mrb[32].mxu1 %vm794_vm3, %v2451_v36 }
 0x38b   :  { %5512 = vmatpush3.bf16.msra.mxu1 %v2795_v46  ;;  %5467 = vmatprep.mubr.msk.bf16.mxu1 %vm794_vm3, %v2452_v27  ;;  %v5501_v58 = vpop.f32.mrb[116].mxu0 }
 0x38c   :  { %v2714_v59 = vpop.f32.mrb[117].mxu0  ;;  %5866 = vmatprep.subr.msk.bf16.mxu1 %vm819_vm2, %v3080_v50 }
 0x38d   :  { %v5502_v60 = vpop.f32.mrb[118].mxu0 }
 0x38e   :  { %v2764_v61 = vpack.c.bf16 %v5502_v60, %v5501_v58  ;;  %v2717_v62 = vpop.f32.mrb[119].mxu0 }
 0x38f   :  { %v2763_v63 = vpack.c.bf16 %v2717_v62, %v2714_v59 }
 0x392   :  { %5468 = vmatmul.mubr.msk.bf16.gmra.mrb[36].mxu1 %vm794_vm3, %v2453_v37 }
 0x393   :  { %5471 = vmatprep.mubr.msk.bf16.mxu1 %vm794_vm3, %v2454_v7  ;;  %v5505_v0 = vpop.f32.mrb[120].mxu0 }
 0x394   :  { %v2730_v1 = vpop.f32.mrb[121].mxu0 }
 0x395   :  { %v5506_v4 = vpop.f32.mrb[122].mxu0 }
 0x396   :  { %v2766_v6 = vpack.c.bf16 %v5506_v4, %v5505_v0  ;;  %v2733_v8 = vpop.f32.mrb[123].mxu0 }
 0x397   :  { %v2765_v9 = vpack.c.bf16 %v2733_v8, %v2730_v1 }
 0x39a   :  { %5472 = vmatmul.mubr.msk.bf16.gmra.mrb[40].mxu1 %vm794_vm3, %v2455_v44 }
 0x39b   :  { %5475 = vmatprep.mubr.msk.bf16.mxu1 %vm794_vm3, %v2456_v48  ;;  %v5509_v10 = vpop.f32.mrb[124].mxu0 }
 0x39c   :  { %v2746_v11 = vpop.f32.mrb[125].mxu0 }
 0x39d   :  { %v5510_v12 = vpop.f32.mrb[126].mxu0 }
 0x39e   :  { %v2768_v13 = vpack.c.bf16 %v5510_v12, %v5509_v10  ;;  %v2749_v14 = vpop.f32.mrb[127].mxu0 }
 0x39f   :  { %v2767_v15 = vpack.c.bf16 %v2749_v14, %v2746_v11 }
 0x3a2   :  { %5476 = vmatmul.mubr.msk.bf16.gmra.mrb[44].mxu1 %vm794_vm3, %v2457_v45 }
 0x3a3   :  { %5513 = vmatprep.mubr.msk.bf16.mxu1 %vm794_vm3, %v2761_v42  ;;  %v5547_v16 = vpop.f32.mrb[128].mxu0 }
 0x3a4   :  { %v3009_v17 = vpop.f32.mrb[129].mxu0 }
 0x3a5   :  { %v5548_v18 = vpop.f32.mrb[130].mxu0 }
 0x3a6   :  { %v3073_v21 = vpack.c.bf16 %v5548_v18, %v5547_v16  ;;  %v3012_v22 = vpop.f32.mrb[131].mxu0 }
 0x3a7   :  { %v3072_v20 = vpack.c.bf16 %v3012_v22, %v3009_v17 }
 0x3aa   :  { %5514 = vmatmul.mubr.msk.bf16.vlgmr.msra.gmra.mrb[32].mxu1 %vm794_vm3, %v2762_v57 }
 0x3ab   :  { %5562 = vmatpush3.bf16.msra.mxu1 %v3106_v19  ;;  %5517 = vmatprep.mubr.msk.bf16.mxu1 %vm794_vm3, %v2763_v63  ;;  %v5551_v36 = vpop.f32.mrb[132].mxu0 }
 0x3ac   :  { %v3025_v25 = vpop.f32.mrb[133].mxu0 }
 0x3ad   :  { %v5552_v35 = vpop.f32.mrb[134].mxu0 }
 0x3ae   :  { %v3075_v28 = vpack.c.bf16 %v5552_v35, %v5551_v36  ;;  %v3028_v30 = vpop.f32.mrb[135].mxu0 }
 0x3af   :  { %v3074_v54 = vpack.c.bf16 %v3028_v30, %v3025_v25 }
 0x3b2   :  { %5518 = vmatmul.mubr.msk.bf16.gmra.mrb[36].mxu1 %vm794_vm3, %v2764_v61 }
 0x3b3   :  { %5521 = vmatprep.mubr.msk.bf16.mxu1 %vm794_vm3, %v2765_v9  ;;  %v5555_v33 = vpop.f32.mrb[136].mxu0 }
 0x3b4   :  { %v3041_v51 = vpop.f32.mrb[137].mxu0 }
 0x3b5   :  { %v5556_v37 = vpop.f32.mrb[138].mxu0 }
 0x3b6   :  { %v3077_v41 = vpack.c.bf16 %v5556_v37, %v5555_v33  ;;  %v3044_v27 = vpop.f32.mrb[139].mxu0 }
 0x3b7   :  { %v3076_v32 = vpack.c.bf16 %v3044_v27, %v3041_v51 }
 0x3ba   :  { %5522 = vmatmul.mubr.msk.bf16.gmra.mrb[40].mxu1 %vm794_vm3, %v2766_v6 }
 0x3bb   :  { %5525 = vmatprep.mubr.msk.bf16.mxu1 %vm794_vm3, %v2767_v15  ;;  %v5559_v34 = vpop.f32.mrb[140].mxu0 }
 0x3bc   :  { %v3057_v43 = vpop.f32.mrb[141].mxu0 }
 0x3bd   :  { %v5560_v44 = vpop.f32.mrb[142].mxu0 }
 0x3be   :  { %v3079_v40 = vpack.c.bf16 %v5560_v44, %v5559_v34  ;;  %v3060_v7 = vpop.f32.mrb[143].mxu0 }
 0x3bf   :  { %v3078_v23 = vpack.c.bf16 %v3060_v7, %v3057_v43 }
 0x3c2   :  { %5526 = vmatmul.mubr.msk.bf16.gmra.mrb[44].mxu1 %vm794_vm3, %v2768_v13 }
 0x3c3   :  { %5563 = vmatprep.mubr.msk.bf16.mxu1 %vm794_vm3, %v3072_v20 }
 0x3ca   :  { %5564 = vmatmul.mubr.msk.bf16.vlgmr.msra.gmra.mrb[32].mxu1 %vm794_vm3, %v3073_v21 }
 0x3cb   :  { %5567 = vmatprep.mubr.msk.bf16.mxu1 %vm794_vm3, %v3074_v54 }
 0x3d2   :  { %5568 = vmatmul.mubr.msk.bf16.gmra.mrb[36].mxu1 %vm794_vm3, %v3075_v28 }
 0x3d3   :  { %5571 = vmatprep.mubr.msk.bf16.mxu1 %vm794_vm3, %v3076_v32 }
 0x3da   :  { %5572 = vmatmul.mubr.msk.bf16.gmra.mrb[40].mxu1 %vm794_vm3, %v3077_v41 }
 0x3db   :  { %5575 = vmatprep.mubr.msk.bf16.mxu1 %vm794_vm3, %v3078_v23 }
 0x3e2   :  { %5576 = vmatmul.mubr.msk.bf16.gmra.mrb[44].mxu1 %vm794_vm3, %v3079_v40 }
 0x49d   :  { %v5565_v45 = vpop.f32.mrb[32].mxu1 }
 0x49e   :  { %v3230_v47 = vadd.f32 %v5565_v45, %v4676_v31  ;;  %v3142_v48 = vpop.f32.mrb[33].mxu1 }
 0x49f   :  { %v3228_v49 = vadd.f32 %v4676_v31, %v3142_v48  ;;  %v5566_v55 = vpop.f32.mrb[34].mxu1 }
 0x4a0   :  { %v3231_v56 = vadd.f32 %v5566_v55, %v4676_v31  ;;  %v3145_v57 = vpop.f32.mrb[35].mxu1  ;;  %v3246_v42 = vmax.f32 %v3230_v47, 0.0 }
 0x4a1   :  { %v3229_v5 = vadd.f32 %v4676_v31, %v3145_v57  ;;  %v3244_v50 = vmax.f32 %v3228_v49, 0.0 }
 0x4a2   :  { %v3247_v46 = vmax.f32 %v3231_v56, 0.0 }
 0x4a3   :  { %v3245_v58 = vmax.f32 %v3229_v5, 0.0 }
 0x4a4   :  { %v3261_v59 = vpack.c.bf16 %v3247_v46, %v3246_v42 }
 0x4a5   :  { %v3260_v60 = vpack.c.bf16 %v3245_v58, %v3244_v50  ;;  %v5569_v61 = vpop.f32.mrb[36].mxu1 }
 0x4a6   :  { %v3234_v62 = vadd.f32 %v5569_v61, %v4676_v31  ;;  %v3158_v63 = vpop.f32.mrb[37].mxu1 }
 0x4a7   :  { %v3232_v0 = vadd.f32 %v4676_v31, %v3158_v63  ;;  %v5570_v1 = vpop.f32.mrb[38].mxu1  ;;  %5581 = vmatprep.mubr.msk.bf16.mxu0 %vm794_vm3, %v3260_v60 }
 0x4a8   :  { %v3235_v4 = vadd.f32 %v5570_v1, %v4676_v31  ;;  %v3161_v6 = vpop.f32.mrb[39].mxu1  ;;  %5582 = vmatmul.mubr.msk.bf16.vlgmr.msra.gmra.mrb[144].mxu0 %vm794_vm3, %v3261_v59  ;;  %v3250_v9 = vmax.f32 %v3234_v62, 0.0 }
 0x4a9   :  { %v3233_v8 = vadd.f32 %v4676_v31, %v3161_v6  ;;  %5598 = vmatpush3.bf16.msra.mxu0 %v5957_v29  ;;  %v3248_v11 = vmax.f32 %v3232_v0, 0.0 }
 0x4aa   :  { %v3251_v10 = vmax.f32 %v3235_v4, 0.0 }
 0x4ab   :  { %v3249_v12 = vmax.f32 %v3233_v8, 0.0 }
 0x4ac   :  { %v3263_v13 = vpack.c.bf16 %v3251_v10, %v3250_v9 }
 0x4ad   :  { %v3262_v14 = vpack.c.bf16 %v3249_v12, %v3248_v11  ;;  %v5573_v15 = vpop.f32.mrb[40].mxu1 }
 0x4ae   :  { %v3238_v16 = vadd.f32 %v5573_v15, %v4676_v31  ;;  %v3174_v17 = vpop.f32.mrb[41].mxu1 }
 0x4af   :  { %v3236_v18 = vadd.f32 %v4676_v31, %v3174_v17  ;;  %v5574_v21 = vpop.f32.mrb[42].mxu1  ;;  %5585 = vmatprep.mubr.msk.bf16.mxu0 %vm794_vm3, %v3262_v14 }
 0x4b0   :  { %v3239_v22 = vadd.f32 %v5574_v21, %v4676_v31  ;;  %v3177_v20 = vpop.f32.mrb[43].mxu1  ;;  %5586 = vmatmul.mubr.msk.bf16.gmra.mrb[148].mxu0 %vm794_vm3, %v3263_v13  ;;  %v3254_v36 = vmax.f32 %v3238_v16, 0.0 }
 0x4b1   :  { %v3237_v19 = vadd.f32 %v4676_v31, %v3177_v20  ;;  %v3252_v35 = vmax.f32 %v3236_v18, 0.0 }
 0x4b2   :  { %v3255_v25 = vmax.f32 %v3239_v22, 0.0 }
 0x4b3   :  { %v3253_v28 = vmax.f32 %v3237_v19, 0.0 }
 0x4b4   :  { %v3265_v30 = vpack.c.bf16 %v3255_v25, %v3254_v36 }
 0x4b5   :  { %v3264_v54 = vpack.c.bf16 %v3253_v28, %v3252_v35  ;;  %v5577_v33 = vpop.f32.mrb[44].mxu1 }
 0x4b6   :  { %v3242_v51 = vadd.f32 %v5577_v33, %v4676_v31  ;;  %v3190_v37 = vpop.f32.mrb[45].mxu1 }
 0x4b7   :  { %v3240_v41 = vadd.f32 %v4676_v31, %v3190_v37  ;;  %v5578_v27 = vpop.f32.mrb[46].mxu1  ;;  %5589 = vmatprep.mubr.msk.bf16.mxu0 %vm794_vm3, %v3264_v54 }
 0x4b8   :  { %v3243_v32 = vadd.f32 %v5578_v27, %v4676_v31  ;;  %v3193_v34 = vpop.f32.mrb[47].mxu1  ;;  %5590 = vmatmul.mubr.msk.bf16.gmra.mrb[152].mxu0 %vm794_vm3, %v3265_v30  ;;  %v3258_v44 = vmax.f32 %v3242_v51, 0.0 }
 0x4b9   :  { %v3241_v43 = vadd.f32 %v4676_v31, %v3193_v34  ;;  %v3256_v7 = vmax.f32 %v3240_v41, 0.0 }
 0x4ba   :  { %v3259_v40 = vmax.f32 %v3243_v32, 0.0 }
 0x4bb   :  { %v3257_v23 = vmax.f32 %v3241_v43, 0.0 }
 0x4bc   :  { %v3267_v29 = vpack.c.bf16 %v3259_v40, %v3258_v44 }
 0x4bd   :  { %v3266_v45 = vpack.c.bf16 %v3257_v23, %v3256_v7 }
 0x4bf   :  { %5593 = vmatprep.mubr.msk.bf16.mxu0 %vm794_vm3, %v3266_v45 }
 0x4c0   :  { %5594 = vmatmul.mubr.msk.bf16.gmra.mrb[156].mxu0 %vm794_vm3, %v3267_v29 }
 0x4c1   :  { %5599 = vmatprep.mubr.msk.bf16.mxu0 %vm307_vm1, %v6249_v26  ;;  %v6092_v26 = vmov 0.0|0.0  }
 0x4c2   :  { %5658 = vmatprep.subr.bf16.mxu1 %v6092_v26 }
 0x4c8   :  { %5600 = vmatmul.mubr.msk.bf16.vlgmr.msra.gmra.mrb[144].mxu0 %vm307_vm1, %v6247_v24  ;;  %v6094_v24 = vmov 0.0  }
 0x4c9   :  { %5603 = vmatprep.mubr.msk.bf16.mxu0 %vm307_vm1, %v6257_v39  ;;  %5647 = vmatprep.mubr.msk.f32.mxu1 %vm6093_vm4, %v6094_v24  ;;  %v5959_v39 = vld [vmem:[%s7140_s13 + $0x8] sm:$0xff]  }
 0x4ca   :  { %5650 = vmatprep.subr.bf16.mxu0 %v6094_v24 }
 0x4d0   :  { %5604 = vmatmul.mubr.msk.bf16.gmra.mrb[148].mxu0 %vm307_vm1, %v6255_v38  ;;  %v5958_v38 = vld [vmem:[%s7140_s13] sm:$0xff]  }
 0x4d1   :  { %5607 = vmatprep.mubr.msk.bf16.mxu0 %vm307_vm1, %v6265_v53  ;;  %5651 = vmatpush3.bf16.msra.mxu0 %v5958_v38  ;;  %v4686_v53 = vld [vmem:[%s7137_s10] ss:$0 sm:$0xff] }
 0x4d2   :  { %5652 = vmatprep.subr.bf16.mxu0 %v6094_v24  ;;  %v3544_v38 = vld [vmem:[%s7139_s12] sm:$0x3]  ;;  %s6044_s12 = scalar_lea.vmem %s4354_s7, 32 }
 0x4d3   :  { %p6045_p0 = scmp.ne.s32.totalorder %s4354_s7, %s6044_s12  ;;  %p6050_p2 = scmp.lt.s32.totalorder %s6044_s12, %s6044_s12 }
 0x4d5   :  { %5653 = vmatpush3.bf16.msra.mxu0 %v5959_v39  ;;  %v5960_v39 = vld [vmem:[%s7142_s15] ss:$16 sps:$4 sm:$0xff]   ;;  %p6051_p3 = por %p6050_p2, %p6049_p1 }
 0x4d7   :  { %p6052_p4 = pnand %p6051_p3, %p6045_p0 }
 0x4d8   :  { %5608 = vmatmul.mubr.msk.bf16.gmra.mrb[152].mxu0 %vm307_vm1, %v6263_v52  ;;  %v4677_v52 = vld [vmem:[%s7135_s8] ss:$0 sm:$0xff] }
 0x4d9   :  { %5611 = vmatprep.mubr.msk.bf16.mxu0 %vm307_vm1, %v6273_v3 }
 0x4e0   :  { %5612 = vmatmul.mubr.msk.bf16.gmra.mrb[156].mxu0 %vm307_vm1, %v6271_v2  ;;  %v5688_v2 = vadd.f32 %v4686_v53, %v4677_v52 }
 0x4e1   :  { %5654 = vmatprep.mubr.msk.bf16.mxu0 %vm6093_vm4, %v6094_v24 }
 0x59b   :  { %v5601_v3 = vpop.f32.mrb[144].mxu0 }
 0x59c   :  { %v5682_v31 = vadd.f32 %v5601_v3, %v4677_v52  ;;  %v3449_v47 = vpop.f32.mrb[145].mxu0  ;;  %v5974_v3 = vld [vmem:[%s7142_s15 + $0x44] ss:$16 sps:$4 sm:$0xff]  }
 0x59d   :  { %v5684_v48 = vadd.f32 %v4677_v52, %v3449_v47  ;;  %v5602_v49 = vpop.f32.mrb[146].mxu0  ;;  %v5962_v52 = vld [vmem:[%s7142_s15 + $0x4] ss:$16 sps:$4 sm:$0xff]  }
 0x59e   :  { %v5683_v55 = vadd.f32 %v5682_v31, %v4686_v53  ;;  %v5687_v56 = vadd.f32 %v5688_v2, %v5602_v49  ;;  %v3452_v57 = vpop.f32.mrb[147].mxu0  ;;  %v5972_v31 = vld [vmem:[%s7142_s15 + $0x40] ss:$16 sps:$4 sm:$0xff]   ;;  %v5980_v47 = vld [vmem:[%s7142_s15 + $0x64] ss:$16 sps:$4 sm:$0xff]  }
 0x59f   :  { %v5685_v5 = vadd.f32 %v5684_v48, %v4686_v53  ;;  %v5689_v42 = vadd.f32 %v5688_v2, %v3452_v57  ;;  %v5965_v53 = vld [vmem:[%s7142_s15 + $0xc] ss:$16 sps:$4 sm:$0xff]   ;;  %v5978_v48 = vld [vmem:[%s7142_s15 + $0x60] ss:$16 sps:$4 sm:$0xff]   ;;  %v5986_v49 = vld [vmem:[%s7142_s15 + $0x84] ss:$16 sps:$4 sm:$0xff]  }
 0x5a0   :  { %v3530_v46 = vmax.f32 %v5683_v55, 0.0  ;;  %v3531_v50 = vmax.f32 %v5687_v56, 0.0  ;;  %3938 = vmatprep.subr.bf16.mxu0 %v5965_v53  ;;  %v5984_v55 = vld [vmem:[%s7142_s15 + $0x80] ss:$16 sps:$4 sm:$0xff]   ;;  %v5992_v56 = vld [vmem:[%s7142_s15 + $0xa4] ss:$16 sps:$4 sm:$0xff]  }
 0x5a1   :  { %v3528_v58 = vmax.f32 %v5685_v5, 0.0  ;;  %v3529_v59 = vmax.f32 %v5689_v42, 0.0  ;;  %v5990_v57 = vld [vmem:[%s7142_s15 + $0xa0] ss:$16 sps:$4 sm:$0xff]   ;;  %v5998_v5 = vld [vmem:[%s7142_s15 + $0xc4] ss:$16 sps:$4 sm:$0xff]  }
 0x5a2   :  { %v5662_v60 = vpack.c.bf16 %v3531_v50, %v3530_v46  ;;  %v5996_v42 = vld [vmem:[%s7142_s15 + $0xc0] ss:$16 sps:$4 sm:$0xff]   ;;  %v5963_v50 = vld [vmem:[%s7142_s15 + $0x8] ss:$16 sps:$4 sm:$0xff]  }
 0x5a3   :  { %v5659_v61 = vpack.c.bf16 %v3529_v59, %v3528_v58  ;;  %v5605_v62 = vpop.f32.mrb[148].mxu0  ;;  %v6029_v53 = vld [vmem:[%s7144_s17 + $0xe8] sm:$0xff]  }
 0x5a4   :  { %v5691_v63 = vadd.f32 %v5688_v2, %v5605_v62  ;;  %v3465_v0 = vpop.f32.mrb[149].mxu0  ;;  %v5977_v62 = vld [vmem:[%s7142_s15 + $0x4c] ss:$16 sps:$4 sm:$0xff]  }
 0x5a5   :  { %v5693_v1 = vadd.f32 %v5688_v2, %v3465_v0  ;;  %v5606_v4 = vpop.f32.mrb[150].mxu0  ;;  %5660 = vmatpush3.bf16.msra.mxu1 %v5659_v61  ;;  %v5969_v61 = vld [vmem:[%s7142_s15 + $0x28] ss:$16 sps:$4 sm:$0xff]   ;;  %v5983_v0 = vld [vmem:[%s7142_s15 + $0x6c] ss:$16 sps:$4 sm:$0xff]  }
 0x5a6   :  { %v5695_v6 = vadd.f32 %v5688_v2, %v5606_v4  ;;  %v3468_v8 = vpop.f32.mrb[151].mxu0  ;;  %5661 = vmatprep.subr.bf16.mxu1 %v6092_v26  ;;  %v3534_v10 = vmax.f32 %v5691_v63, 0.0  ;;  %v5975_v63 = vld [vmem:[%s7142_s15 + $0x48] ss:$16 sps:$4 sm:$0xff]   ;;  %v5989_v4 = vld [vmem:[%s7142_s15 + $0x8c] ss:$16 sps:$4 sm:$0xff]  }
 0x5a7   :  { %v5697_v9 = vadd.f32 %v5688_v2, %v3468_v8  ;;  %v3532_v12 = vmax.f32 %v5693_v1, 0.0  ;;  %v5981_v1 = vld [vmem:[%s7142_s15 + $0x68] ss:$16 sps:$4 sm:$0xff]   ;;  %v5995_v8 = vld [vmem:[%s7142_s15 + $0xac] ss:$16 sps:$4 sm:$0xff]  }
 0x5a8   :  { %v3535_v11 = vmax.f32 %v5695_v6, 0.0  ;;  %v5987_v6 = vld [vmem:[%s7142_s15 + $0x88] ss:$16 sps:$4 sm:$0xff]  }
 0x5a9   :  { %v3533_v13 = vmax.f32 %v5697_v9, 0.0  ;;  %5663 = vmatpush3.bf16.msra.mxu1 %v5662_v60  ;;  %v5971_v60 = vld [vmem:[%s7142_s15 + $0x2c] ss:$16 sps:$4 sm:$0xff]   ;;  %v5993_v9 = vld [vmem:[%s7142_s15 + $0xa8] ss:$16 sps:$4 sm:$0xff]  }
 0x5aa   :  { %v5668_v14 = vpack.c.bf16 %v3535_v11, %v3534_v10  ;;  %5664 = vmatprep.subr.bf16.mxu1 %v6092_v26  ;;  %v6001_v10 = vld [vmem:[%s7142_s15 + $0xcc] ss:$16 sps:$4 sm:$0xff]   ;;  %v5999_v11 = vld [vmem:[%s7142_s15 + $0xc8] ss:$16 sps:$4 sm:$0xff]  }
 0x5ab   :  { %v5665_v15 = vpack.c.bf16 %v3533_v13, %v3532_v12  ;;  %v5609_v16 = vpop.f32.mrb[152].mxu0  ;;  %v6004_v12 = vld [vmem:[%s7142_s15 + $0xe4] ss:$16 sps:$4 sm:$0xff]   ;;  %v6007_v13 = vld [vmem:[%s7142_s15 + $0xec] ss:$16 sps:$4 sm:$0xff]  }
 0x5ac   :  { %v5699_v17 = vadd.f32 %v5688_v2, %v5609_v16  ;;  %v3481_v18 = vpop.f32.mrb[153].mxu0  ;;  %v6095_v16 = vmov 0  }
 0x5ad   :  { %v5701_v21 = vadd.f32 %v5688_v2, %v3481_v18  ;;  %v5610_v22 = vpop.f32.mrb[154].mxu0  ;;  %5666 = vmatpush3.bf16.msra.mxu1 %v5665_v15  ;;  %v6005_v15 = vld [vmem:[%s7142_s15 + $0xe8] ss:$16 sps:$4 sm:$0xff]  }
 0x5ae   :  { %v5703_v20 = vadd.f32 %v5688_v2, %v5610_v22  ;;  %v3484_v19 = vpop.f32.mrb[155].mxu0  ;;  %5667 = vmatprep.subr.bf16.mxu1 %v6092_v26  ;;  %v3538_v25 = vmax.f32 %v5699_v17, 0.0  ;;  %v4696_v17 = vld [vmem:[%s7141_s14] ss:$0 sm:$0xff] }
 0x5af   :  { %v5705_v36 = vadd.f32 %v5688_v2, %v3484_v19  ;;  %v3536_v28 = vmax.f32 %v5701_v21, 0.0 }
 0x5b0   :  { %v3539_v35 = vmax.f32 %v5703_v20, 0.0 }
 0x5b1   :  { %v3537_v30 = vmax.f32 %v5705_v36, 0.0  ;;  %5669 = vmatpush3.bf16.msra.mxu1 %v5668_v14  ;;  %v6002_v14 = vld [vmem:[%s7142_s15 + $0xe0] ss:$16 sps:$4 sm:$0xff]  }
 0x5b2   :  { %v5674_v54 = vpack.c.bf16 %v3539_v35, %v3538_v25  ;;  %5670 = vmatprep.subr.bf16.mxu1 %v6092_v26 }
 0x5b3   :  { %v5671_v33 = vpack.c.bf16 %v3537_v30, %v3536_v28  ;;  %v5613_v51 = vpop.f32.mrb[156].mxu0  ;;  %v6008_v28 = vld [vmem:[%s7144_s17 + $0x40] sm:$0xff]  }
 0x5b4   :  { %v5707_v37 = vadd.f32 %v5688_v2, %v5613_v51  ;;  %v3497_v41 = vpop.f32.mrb[157].mxu0  ;;  %v6009_v30 = vld [vmem:[%s7144_s17 + $0xc0] sm:$0xff]   ;;  %v6012_v51 = vld [vmem:[%s7144_s17 + $0x48] sm:$0xff]  }
 0x5b5   :  { %v5709_v27 = vadd.f32 %v5688_v2, %v3497_v41  ;;  %v5614_v32 = vpop.f32.mrb[158].mxu0  ;;  %5672 = vmatpush3.bf16.msra.mxu1 %v5671_v33  ;;  %v6011_v33 = vld [vmem:[%s7144_s17 + $0x80] sm:$0xff]   ;;  %v6014_v41 = vld [vmem:[%s7144_s17 + $0x8] sm:$0xff]  }
 0x5b6   :  { %v5711_v34 = vadd.f32 %v5688_v2, %v5614_v32  ;;  %v3500_v43 = vpop.f32.mrb[159].mxu0  ;;  %5673 = vmatprep.subr.bf16.mxu1 %v6092_v26  ;;  %v3542_v40 = vmax.f32 %v5707_v37, 0.0  ;;  %v6013_v37 = vld [vmem:[%s7144_s17 + $0xc8] sm:$0xff]   ;;  %v6016_v32 = vld [vmem:[%s7144_s17 + $0x50] sm:$0xff]  }
 0x5b7   :  { %v5713_v44 = vadd.f32 %v5688_v2, %v3500_v43  ;;  %v3540_v23 = vmax.f32 %v5709_v27, 0.0  ;;  %v5966_v2 = vld [vmem:[%s7142_s15 + $0x20] ss:$16 sps:$4 sm:$0xff]   ;;  %v6015_v27 = vld [vmem:[%s7144_s17 + $0x88] sm:$0xff]  }
 0x5b8   :  { %v3543_v7 = vmax.f32 %v5711_v34, 0.0  ;;  %v6017_v34 = vld [vmem:[%s7144_s17 + $0xd0] sm:$0xff]  }
 0x5b9   :  { %v3541_v29 = vmax.f32 %v5713_v44, 0.0  ;;  %5675 = vmatpush3.bf16.msra.mxu1 %v5674_v54  ;;  %v6010_v54 = vld [vmem:[%s7144_s17] sm:$0xff]   ;;  %v6018_v43 = vld [vmem:[%s7144_s17 + $0x10] sm:$0xff]  }
 0x5ba   :  { %v5680_v45 = vpack.c.bf16 %v3543_v7, %v3542_v40  ;;  %5676 = vmatprep.subr.bf16.mxu1 %v6092_v26  ;;  %v6019_v44 = vld [vmem:[%s7144_s17 + $0x90] sm:$0xff]   ;;  %v6020_v40 = vld [vmem:[%s7144_s17 + $0x58] sm:$0xff]  }
 0x5bb   :  { %v5677_v24 = vpack.c.bf16 %v3541_v29, %v3540_v23  ;;  %v6021_v7 = vld [vmem:[%s7144_s17 + $0xd8] sm:$0xff]  }
 0x5bc   :  { %v6022_v23 = vld [vmem:[%s7144_s17 + $0x18] sm:$0xff]  }
 0x5bd   :  { %5678 = vmatpush3.bf16.msra.mxu1 %v5677_v24  ;;  %v6023_v29 = vld [vmem:[%s7144_s17 + $0x98] sm:$0xff]   ;;  %v6025_v24 = vld [vmem:[%s7144_s17 + $0xe0] sm:$0xff]  }
 0x5be   :  { %5679 = vmatprep.subr.bf16.mxu1 %v6092_v26  ;;  %v5968_v26 = vld [vmem:[%s7142_s15 + $0x24] ss:$16 sps:$4 sm:$0xff]  }
 0x5c1   :  { %5681 = vmatpush3.bf16.msra.mxu1 %v5680_v45  ;;  %v6024_v45 = vld [vmem:[%s7144_s17 + $0x60] sm:$0xff]  }
 0x5c2   :  { %3897 = vmatprep.subr.bf16.mxu1 %v5962_v52  ;;  %v6028_v52 = vld [vmem:[%s7144_s17 + $0x68] sm:$0xff]  }
 0x5c4   :  { %5648 = vmatmul.mubr.f32.vlgmr.msra.gmra.mrb[48].mxu1 %v3544_v38  ;;  %v6026_v38 = vld [vmem:[%s7144_s17 + $0x20] sm:$0xff]  }
 0x5c5   :  { %3898 = vmatpush1.bf16.msra.mxu1 %v5960_v39  ;;  %3929 = vmatprep.mubr.bf16.mxu1 %v6095_v16  ;;  %v6027_v39 = vld [vmem:[%s7144_s17 + $0xa0] sm:$0xff]  }
 0x5c6   :  { %3899 = vmatprep.subr.bf16.mxu1 %v5968_v26  ;;  %v6030_v26 = vld [vmem:[%s7144_s17 + $0x28] sm:$0xff]  }
 0x5c9   :  { %3900 = vmatpush1.bf16.msra.mxu1 %v5966_v2  ;;  %v6031_v2 = vld [vmem:[%s7144_s17 + $0xa8] sm:$0xff]  }
 0x5ca   :  { %3901 = vmatprep.subr.bf16.mxu1 %v5974_v3  ;;  %v6032_v3 = vld [vmem:[%s7144_s17 + $0x70] sm:$0xff]  }
 0x5cd   :  { %3902 = vmatpush1.bf16.msra.mxu1 %v5972_v31  ;;  %v6033_v31 = vld [vmem:[%s7144_s17 + $0xf0] sm:$0xff]  }
 0x5ce   :  { %3903 = vmatprep.subr.bf16.mxu1 %v5980_v47  ;;  %v6034_v47 = vld [vmem:[%s7144_s17 + $0x30] sm:$0xff]  }
 0x5d1   :  { %3904 = vmatpush1.bf16.msra.mxu1 %v5978_v48  ;;  %v6035_v48 = vld [vmem:[%s7144_s17 + $0xb0] sm:$0xff]  }
 0x5d2   :  { %3905 = vmatprep.subr.bf16.mxu1 %v5986_v49  ;;  %v6036_v49 = vld [vmem:[%s7144_s17 + $0x78] sm:$0xff]  }
 0x5d5   :  { %3906 = vmatpush1.bf16.msra.mxu1 %v5984_v55  ;;  %v6037_v55 = vld [vmem:[%s7144_s17 + $0xf8] sm:$0xff]  }
 0x5d6   :  { %3907 = vmatprep.subr.bf16.mxu1 %v5992_v56  ;;  %v6038_v56 = vld [vmem:[%s7144_s17 + $0x38] sm:$0xff]  }
 0x5d9   :  { %3908 = vmatpush1.bf16.msra.mxu1 %v5990_v57  ;;  %v6039_v57 = vld [vmem:[%s7144_s17 + $0xb8] sm:$0xff]  }
 0x5da   :  { %3909 = vmatprep.subr.bf16.mxu1 %v5998_v5 }
 0x5dd   :  { %3910 = vmatpush1.bf16.msra.mxu1 %v5996_v42 }
 0x5de   :  { %3911 = vmatprep.subr.bf16.mxu1 %v6004_v12 }
 0x5e1   :  { %3912 = vmatpush1.bf16.msra.mxu1 %v6002_v14 }
 0x5e2   :  { %5047 = vmatprep.subr.bf16.mxu1 %v6008_v28 }
 0x697   :  { %v3611_v46 = vpop.f32.mrb[48].mxu1 }
 0x698   :  { %v3615_v58 = vpack.c.bf16 %v3611_v46, %v3611_v46  ;;  %v5649_v59 = vpop.f32.mrb[49].mxu1 }
 0x69a   :  { %5655 = vmatmul.mubr.msk.bf16.vlgmr.msra.gmra.mrb[160].mxu0 %vm146_vm0, %v3615_v58  ;;  %v3717_v58 = vlaneseq }
 0x69b   :  { %3939 = vmatpush1.bf16.msra.mxu0 %v5963_v50  ;;  %3970 = vmatprep.mubr.bf16.mxu0 %v6095_v16 }
 0x69c   :  { %3940 = vmatprep.subr.bf16.mxu0 %v5971_v60  ;;  %v3718_v59 = vshrl.u32 %v3717_v58, 7 }
 0x69e   :  { %v3719_v60 = vsub.s32 0, %v3718_v59 }
 0x69f   :  { %3941 = vmatpush1.bf16.msra.mxu0 %v5969_v61  ;;  %v3727_v61 = vsub.s32 2, %v3718_v59 }
 0x6a0   :  { %3942 = vmatprep.subr.bf16.mxu0 %v5977_v62  ;;  %v3715_v62 = vld [vmem:[%s7143_s16] sm:$0xf] }
 0x6a3   :  { %3943 = vmatpush1.bf16.msra.mxu0 %v5975_v63  ;;  %v3723_v63 = vsub.s32 1, %v3718_v59 }
 0x6a4   :  { %3944 = vmatprep.subr.bf16.mxu0 %v5983_v0  ;;  %v3731_v0 = vsub.s32 3, %v3718_v59 }
 0x6a7   :  { %3945 = vmatpush1.bf16.msra.mxu0 %v5981_v1  ;;  %v3720_v1 = vrot.slane %v3715_v62, %v3719_v60 }
 0x6a8   :  { %3946 = vmatprep.subr.bf16.mxu0 %v5989_v4  ;;  %v3728_v4 = vrot.slane %v3715_v62, %v3727_v61 }
 0x6ab   :  { %3947 = vmatpush1.bf16.msra.mxu0 %v5987_v6  ;;  %v3724_v6 = vrot.slane %v3715_v62, %v3723_v63 }
 0x6ac   :  { %3948 = vmatprep.subr.bf16.mxu0 %v5995_v8  ;;  %v3732_v8 = vrot.slane %v3715_v62, %v3731_v0 }
 0x6af   :  { %3949 = vmatpush1.bf16.msra.mxu0 %v5993_v9 }
 0x6b0   :  { %3950 = vmatprep.subr.bf16.mxu0 %v6001_v10 }
 0x6b3   :  { %3951 = vmatpush1.bf16.msra.mxu0 %v5999_v11 }
 0x6b4   :  { %3952 = vmatprep.subr.bf16.mxu0 %v6007_v13 }
 0x6b7   :  { %3953 = vmatpush1.bf16.msra.mxu0 %v6005_v15 }
 0x6b8   :  { %5069 = vmatprep.subr.bf16.mxu0 %v6009_v30 }
 0x76d   :  { %v3676_v18 = vpop.f32.mrb[160].mxu0 }
 0x76e   :  { %v6992_v21 = vadd.f32 %v4696_v17, %v3676_v18  ;;  %v5656_v22 = vpop.f32.mrb[161].mxu0 }
 0x76f   :  { %v3679_v20 = vpop.f32.mrb[162].mxu0 }
 0x770   :  { %v3682_v19 = vpack.c.bf16 %v6992_v21, %v6992_v21  ;;  %v5657_v36 = vpop.f32.mrb[163].mxu0  ;;  %v4330_v25 = vmul.f32 %v6992_v21, %v6992_v21 }
 0x772   :  { %3930 = vmatmul.mubr.bf16.vlgmr.msra.gmra.mrb[52].mxu1 %v3682_v19  ;;  %3971 = vmatmul.mubr.bf16.vlgmr.msra.gmra.mrb[164].mxu0 %v3682_v19  ;;  %v4332_v35 = vsel %vm4331_vm5, %v4330_v25, 0.0 }
 0x773   :  { %4333 = vadd.xlane.f32.xlu0 %v4332_v35  ;;  %5048 = vmatpush3.bf16.msra.mxu1 %v6010_v54 }
 0x774   :  { %5070 = vmatpush3.bf16.msra.mxu0 %v6011_v33  ;;  %5049 = vmatprep.subr.bf16.mxu1 %v6012_v51 }
 0x775   :  { %5071 = vmatprep.subr.bf16.mxu0 %v6013_v37  ;;  %v4732_v37 = vld [vmem:[%s7145_s18] ss:$0 sm:$0xff] }
 0x777   :  { %5050 = vmatpush3.bf16.msra.mxu1 %v6014_v41 }
 0x778   :  { %5072 = vmatpush3.bf16.msra.mxu0 %v6015_v27  ;;  %5051 = vmatprep.subr.bf16.mxu1 %v6016_v32 }
 0x779   :  { %5073 = vmatprep.subr.bf16.mxu0 %v6017_v34 }
 0x77b   :  { %5052 = vmatpush3.bf16.msra.mxu1 %v6018_v43 }
 0x77c   :  { %5074 = vmatpush3.bf16.msra.mxu0 %v6019_v44  ;;  %5053 = vmatprep.subr.bf16.mxu1 %v6020_v40 }
 0x77d   :  { %5075 = vmatprep.subr.bf16.mxu0 %v6021_v7 }
 0x77f   :  { %5054 = vmatpush3.bf16.msra.mxu1 %v6022_v23 }
 0x780   :  { %5076 = vmatpush3.bf16.msra.mxu0 %v6023_v29  ;;  %5055 = vmatprep.subr.bf16.mxu1 %v6024_v45 }
 0x781   :  { %5077 = vmatprep.subr.bf16.mxu0 %v6025_v24 }
 0x783   :  { %5056 = vmatpush3.bf16.msra.mxu1 %v6026_v38 }
 0x784   :  { %5078 = vmatpush3.bf16.msra.mxu0 %v6027_v39  ;;  %5057 = vmatprep.subr.bf16.mxu1 %v6028_v52 }
 0x785   :  { %5079 = vmatprep.subr.bf16.mxu0 %v6029_v53 }
 0x787   :  { %5058 = vmatpush3.bf16.msra.mxu1 %v6030_v26 }
 0x788   :  { %5080 = vmatpush3.bf16.msra.mxu0 %v6031_v2  ;;  %5059 = vmatprep.subr.bf16.mxu1 %v6032_v3 }
 0x789   :  { %5081 = vmatprep.subr.bf16.mxu0 %v6033_v31 }
 0x78b   :  { %5060 = vmatpush3.bf16.msra.mxu1 %v6034_v47 }
 0x78c   :  { %5082 = vmatpush3.bf16.msra.mxu0 %v6035_v48  ;;  %5061 = vmatprep.subr.bf16.mxu1 %v6036_v49 }
 0x78d   :  { %5083 = vmatprep.subr.bf16.mxu0 %v6037_v55 }
 0x78f   :  { %5062 = vmatpush3.bf16.msra.mxu1 %v6038_v56 }
 0x790   :  { %5084 = vmatpush3.bf16.msra.mxu0 %v6039_v57 }
 0x800   :  { %v4334_v5 = vpop.xlane.xlu0 %4333 }
 0x801   :  { %v4335_v42 = vmax.f32 %v4334_v5, 1e-24 }
 0x803   :  { %6040 = vrsqrt.f32 %v4335_v42 }
 0x80d   :  { %v6041_v46 = vpop.eup %6040 }
 0x80e   :  { %v4337_v50 = vmul.f32 %v6041_v46, %v6992_v21 }
 0x810   :  { %4338 = vst [vmem:[#allocation2] sm:$0x3] %v4337_v50 }
 0x845   :  { %v3931_v9 = vpop.f32.mrb[52].mxu1  ;;  %v3972_v10 = vpop.f32.mrb[164].mxu0 }
 0x846   :  { %v3932_v11 = vadd.f32 %v3931_v9, %v3720_v1  ;;  %v3973_v12 = vadd.f32 %v3972_v10, %v3728_v4  ;;  %v3933_v13 = vpop.f32.mrb[53].mxu1  ;;  %v3974_v14 = vpop.f32.mrb[165].mxu0 }
 0x847   :  { %v3934_v15 = vadd.f32 %v3933_v13, %v3724_v6  ;;  %v3975_v16 = vadd.f32 %v3974_v14, %v3732_v8  ;;  %v3935_v17 = vpop.f32.mrb[54].mxu1  ;;  %v3976_v18 = vpop.f32.mrb[166].mxu0 }
 0x848   :  { %v3979_v21 = vmax.f32 %v3932_v11, 0.0  ;;  %v3981_v22 = vmax.f32 %v3973_v12, 0.0  ;;  %v3936_v20 = vpop.f32.mrb[55].mxu1  ;;  %v3977_v19 = vpop.f32.mrb[167].mxu0 }
 0x849   :  { %v3980_v36 = vmax.f32 %v3934_v15, 0.0  ;;  %v3982_v25 = vmax.f32 %v3975_v16, 0.0 }
 0x84a   :  { %v3983_v30 = vpack.c.bf16 %v3979_v21, %v3979_v21  ;;  %v3985_v54 = vpack.c.bf16 %v3981_v22, %v3981_v22 }
 0x84b   :  { %v3984_v35 = vpack.c.bf16 %v3980_v36, %v3980_v36  ;;  %v3986_v28 = vpack.c.bf16 %v3982_v25, %v3982_v25 }
 0x84d   :  { %4282 = vmatprep.mubr.bf16.mxu1 %v3984_v35  ;;  %4322 = vmatprep.mubr.bf16.mxu0 %v3986_v28 }
 0x84e   :  { %4283 = vmatmul.mubr.bf16.vlgmr.msra.gmra.mrb[56].mxu1 %v3983_v30  ;;  %4323 = vmatmul.mubr.bf16.vlgmr.msra.gmra.mrb[168].mxu0 %v3985_v54 }
 0x921   :  { %v5063_v33 = vpop.f32.mrb[56].mxu1  ;;  %v5085_v51 = vpop.f32.mrb[168].mxu0 }
 0x922   :  { %v5064_v41 = vpop.f32.mrb[57].mxu1  ;;  %v5086_v27 = vpop.f32.mrb[169].mxu0 }
 0x923   :  { %v5065_v32 = vadd.f32 %v5064_v41, %v5063_v33  ;;  %v5087_v34 = vadd.f32 %v5086_v27, %v5085_v51  ;;  %v5066_v43 = vpop.f32.mrb[58].mxu1  ;;  %v5088_v44 = vpop.f32.mrb[170].mxu0 }
 0x924   :  { %v5067_v40 = vpop.f32.mrb[59].mxu1  ;;  %v5089_v7 = vpop.f32.mrb[171].mxu0 }
 0x925   :  { %v4285_v23 = vadd.f32 %v5065_v32, %v4732_v37 }
 0x927   :  { %v4325_v29 = vadd.f32 %v5087_v34, %v4285_v23 }
 0x929   :  { %v4339_v45 = vmul.f32 %v4325_v29, %v4325_v29 }
 0x92b   :  { %v4340_v24 = vsel %vm4331_vm5, %v4339_v45, 0.0 }
 0x92c   :  { %4341 = vadd.xlane.f32.xlu0 %v4340_v24 }
 0x92d   :  { %6055 = shalt.err (!%p6052_p4)
}
 0x92e   :  { %s6056_s5 = scalar_lea.hbm %s7146_s19, 32 }
 0x92f   :  { %p6057_p5 = scmp.ne.s32.totalorder %s7146_s19, %s6056_s5  ;;  %p6060_p6 = scmp.lt.u32.totalorder %s6056_s5, %s7146_s19 }
 0x931   :  { %p6062_p7 = pnand %p6060_p6, %p6057_p5 }
 0x933   :  { %6065 = shalt.err (!%p6062_p7)
}
 0x934   :  { %4356 = dma.vmem_to_hbm [thread:$0]  %s4354_s7, 32, %s7146_s19, [#allocation3]  }
 0x935   :  { %s6097_s23 = smov [#allocation4]  }
 0x936   :  { %s4363_s15 = sshll.u32 %s6097_s23, 4  ;;  %s4364_s15 = int_to_ptr.vmem [resolvable:$true] %s4363_s15 }
 0x937   :  { %s6066_s14 = scalar_lea.vmem %s4364_s15, 32  ;;  %p6071_p9 = scmp.lt.s32.totalorder %s4364_s15, %s4364_s15 }
 0x938   :  { %p6067_p8 = scmp.ne.s32.totalorder %s4364_s15, %s6066_s14  ;;  %p6072_p10 = scmp.lt.s32.totalorder %s6066_s14, %s6066_s14 }
 0x93a   :  { %p6073_p11 = por %p6072_p10, %p6071_p9 }
 0x93c   :  { %p6074_p12 = pnand %p6073_p11, %p6067_p8 }
 0x9b9   :  { %v4342_v38 = vpop.xlane.xlu0 %4341 }
 0x9ba   :  { %v4343_v39 = vmax.f32 %v4342_v38, 1e-24 }
 0x9bc   :  { %6042 = vrsqrt.f32 %v4343_v39 }
 0x9c6   :  { %v6043_v52 = vpop.eup %6042 }
 0x9c7   :  { %v4345_v53 = vmul.f32 %v6043_v52, %v4325_v29 }
 0x9c9   :  { %4346 = vst [vmem:[#allocation4] sm:$0x3] %v4345_v53 }
 0x9ca   :  { %6077 = shalt.err (!%p6074_p12)
}
 0x9cb   :  { %s6078_s19 = scalar_lea.hbm %s7147_s20, 32 }
 0x9cc   :  { %p6079_p13 = scmp.ne.s32.totalorder %s7147_s20, %s6078_s19  ;;  %p6082_p0 = scmp.lt.u32.totalorder %s6078_s19, %s7147_s20 }
 0x9ce   :  { %p6084_p1 = pnand %p6082_p0, %p6079_p13 }
 0x9d0   :  { %6087 = shalt.err (!%p6084_p1)
}
 0x9d1   :  { %4366 = dma.vmem_to_hbm [thread:$0]  %s4364_s15, 32, %s7147_s20, [#allocation5]  }
 0x9d2   :  { %6088 = dma.done.wait [#allocation3], 32  }
 0x9d3   :  { %6089 = vsyncadd [#allocation3], 4294967264 }
 0x9d4   :  { %6090 = dma.done.wait [#allocation5], 32  }
 0x9d5   :  { %6091 = vsyncadd [#allocation5], 4294967264 }
 0x9d6   :  { %4373 = vsyncpa [#allocation3], 1 }
 0x9d7   :  { %4374 = vsyncpa [#allocation5], 1 }

</bundles_post_ra>
